<compile_context>
chip_gen: v6e
topology: v6e:2x2x1
jax: 0.10.0
libtpu: 0.0.40
codegen_flags: <defaults>
</compile_context>

<pallas_src>
import functools
import math

import jax
import jax.numpy as jnp
from jax.experimental import pallas as pl
from jax.experimental.pallas import tpu as pltpu


def _mlprnn_kernel(x_ref, h0_ref, wlin_ref, blin_ref, wih_ref, whh_ref,
                   bih_ref, bhh_ref, lin_ref, rnn_ref, *, seq_len):
    # Hoist all weight/bias loads out of the unrolled time loop.
    wlin = wlin_ref[...]                                            # (I, 3H)
    blin = blin_ref[...]                                            # (1, 3H)
    wih_r, wih_z, wih_n = wih_ref[0], wih_ref[1], wih_ref[2]        # (I, H) each
    whh_r, whh_z, whh_n = whh_ref[0], whh_ref[1], whh_ref[2]        # (H, H) each
    bih_r, bih_z, bih_n = bih_ref[0], bih_ref[1], bih_ref[2]        # (1, H) each
    bhh_r, bhh_z, bhh_n = bhh_ref[0], bhh_ref[1], bhh_ref[2]        # (1, H) each

    h = h0_ref[...]                                                 # (N, H)

    for t in range(seq_len):            # static unroll; seq_len is small
        x_t = x_ref[t]                  # (N, I) -- leading-axis index, no lane slicing

        # Parallel linear branch: y = x @ W^T + b (W^T passed pre-transposed).
        lin_t = jnp.dot(x_t, wlin, preferred_element_type=jnp.float32) + blin
        lin_ref[t] = lin_t.astype(lin_ref.dtype)

        # GRU gates (PyTorch gate order r, z, n); weights pre-split per gate
        # wrapper-side so there is no in-kernel slicing of a (N, 3H) block.
        gi_r = jnp.dot(x_t, wih_r, preferred_element_type=jnp.float32) + bih_r
        gi_z = jnp.dot(x_t, wih_z, preferred_element_type=jnp.float32) + bih_z
        gi_n = jnp.dot(x_t, wih_n, preferred_element_type=jnp.float32) + bih_n
        gh_r = jnp.dot(h, whh_r, preferred_element_type=jnp.float32) + bhh_r
        gh_z = jnp.dot(h, whh_z, preferred_element_type=jnp.float32) + bhh_z
        gh_n = jnp.dot(h, whh_n, preferred_element_type=jnp.float32) + bhh_n

        r = jax.nn.sigmoid(gi_r + gh_r)
        z = jax.nn.sigmoid(gi_z + gh_z)
        n = jnp.tanh(gi_n + r * gh_n)
        h = (1.0 - z) * n + z * h

        rnn_ref[t] = h.astype(rnn_ref.dtype)


def mlp_rnn_forward(x, rnn_state, params):
    """x: (S, N, I) f32; rnn_state: (1, N, H) f32.  Returns (out (S,N,4H), state (1,N,H))."""
    S, N, I = x.shape
    H = rnn_state.shape[-1]

    # --- wrapper-side weight re-layout (free; removes in-kernel transposes/slicing) ---
    wlin_t = params["w_lin"].T                                              # (I, 3H)
    blin = params["b_lin"].reshape(1, 3 * H)                                # (1, 3H)
    wih_s = jnp.transpose(params["w_ih"].reshape(3, H, I), (0, 2, 1))       # (3, I, H)
    whh_s = jnp.transpose(params["w_hh"].reshape(3, H, H), (0, 2, 1))       # (3, H, H)
    bih_s = params["b_ih"].reshape(3, 1, H)                                 # (3, 1, H)
    bhh_s = params["b_hh"].reshape(3, 1, H)                                 # (3, 1, H)
    h0 = rnn_state[0]                                                       # (N, H)

    kernel = functools.partial(_mlprnn_kernel, seq_len=S)
    vmem = pl.BlockSpec(memory_space=pltpu.MemorySpace.VMEM)  # whole array resident in VMEM

    lin_out, rnn_out = pl.pallas_call(
        kernel,
        out_shape=(jax.ShapeDtypeStruct((S, N, 3 * H), x.dtype),
                   jax.ShapeDtypeStruct((S, N, H), x.dtype)),
        in_specs=[vmem] * 8,
        out_specs=(vmem, vmem),
    )(x, h0, wlin_t, blin, wih_s, whh_s, bih_s, bhh_s)

    # Lane-offset concat (at 3H) is cheap layout plumbing; keep it as an XLA op.
    out = jnp.concatenate([lin_out, rnn_out], axis=-1)                      # (S, N, 4H)
    new_state = rnn_out[-1:]                                                # (1, N, H)
    return out, new_state


def _reference(x, rnn_state, params):
    """Pure-JAX reference mirroring the PyTorch MLPRNN forward."""
    H = rnn_state.shape[-1]
    lin = x @ params["w_lin"].T + params["b_lin"]
    wih, whh = params["w_ih"], params["w_hh"]
    bih, bhh = params["b_ih"], params["b_hh"]

    def step(h, x_t):
        gi = x_t @ wih.T + bih
        gh = h @ whh.T + bhh
        i_r, i_z, i_n = gi[:, :H], gi[:, H:2 * H], gi[:, 2 * H:]
        h_r, h_z, h_n = gh[:, :H], gh[:, H:2 * H], gh[:, 2 * H:]
        r = jax.nn.sigmoid(i_r + h_r)
        z = jax.nn.sigmoid(i_z + h_z)
        n = jnp.tanh(i_n + r * h_n)
        h_new = (1.0 - z) * n + z * h
        return h_new, h_new

    h_last, hs = jax.lax.scan(step, rnn_state[0], x)
    out = jnp.concatenate([lin, hs], axis=-1)
    return out, h_last[None]


if __name__ == "__main__":
    # Small shapes consistent with the module: seq=8, batch=2, input_dim=32,
    # output_dim=32 -> rnn_size = 8.
    S, N, I, O = 8, 2, 32, 32
    H = O // 4

    key = jax.random.PRNGKey(0)
    kx, kh, k1, k2, k3, k4, k5 = jax.random.split(key, 7)

    x = jax.random.normal(kx, (S, N, I), dtype=jnp.float32)
    rnn_state = jax.random.normal(kh, (1, N, H), dtype=jnp.float32)

    def uinit(k, shape, fan_in):
        bound = 1.0 / math.sqrt(fan_in)
        return jax.random.uniform(k, shape, jnp.float32, -bound, bound)

    params = {
        "w_lin": uinit(k1, (3 * H, I), I),                 # MLP linear weight
        "b_lin": jnp.zeros((3 * H,), jnp.float32),         # initialize_weights zeroes bias
        "w_ih": uinit(k2, (3 * H, I), H),                  # GRU weight_ih_l0 (r,z,n rows)
        "w_hh": uinit(k3, (3 * H, H), H),                  # GRU weight_hh_l0
        "b_ih": uinit(k4, (3 * H,), H),                    # GRU bias_ih_l0
        "b_hh": uinit(k5, (3 * H,), H),                    # GRU bias_hh_l0
    }

    out, new_state = mlp_rnn_forward(x, rnn_state, params)
    out = jax.block_until_ready(out)
    new_state = jax.block_until_ready(new_state)

    ref_out, ref_state = _reference(x, rnn_state, params)
    assert out.shape == (S, N, O)
    assert new_state.shape == (1, N, H)
    assert jnp.allclose(out, ref_out, atol=1e-5, rtol=1e-5), "output mismatch vs reference"
    assert jnp.allclose(new_state, ref_state, atol=1e-5, rtol=1e-5), "state mismatch vs reference"

    print("KERNEL_OK")
</pallas_src>

<mosaic_0001>
module attributes {stable_mosaic.version = 11 : i64} {
  func.func @_mlprnn_kernel(%arg0: memref<8x2x32xf32, #tpu.memory_space<vmem>>, %arg1: memref<2x8xf32, #tpu.memory_space<vmem>>, %arg2: memref<32x24xf32, #tpu.memory_space<vmem>>, %arg3: memref<1x24xf32, #tpu.memory_space<vmem>>, %arg4: memref<3x32x8xf32, #tpu.memory_space<vmem>>, %arg5: memref<3x8x8xf32, #tpu.memory_space<vmem>>, %arg6: memref<3x1x8xf32, #tpu.memory_space<vmem>>, %arg7: memref<3x1x8xf32, #tpu.memory_space<vmem>>, %arg8: memref<8x2x24xf32, #tpu.memory_space<vmem>>, %arg9: memref<8x2x8xf32, #tpu.memory_space<vmem>>) attributes {dimension_semantics = [], scalar_prefetch = 0 : i64, scratch_operands = 0 : i64, tpu.core_type = #tpu.core_type<tc>} {
    %c0 = arith.constant 0 : index
    %c0_0 = arith.constant 0 : index
    %0 = vector.load %arg2[%c0, %c0_0] : memref<32x24xf32, #tpu.memory_space<vmem>>, vector<32x24xf32>
    %c0_1 = arith.constant 0 : index
    %c0_2 = arith.constant 0 : index
    %1 = vector.load %arg3[%c0_1, %c0_2] : memref<1x24xf32, #tpu.memory_space<vmem>>, vector<1x24xf32>
    %c0_3 = arith.constant 0 : index
    %c0_4 = arith.constant 0 : index
    %c0_5 = arith.constant 0 : index
    %2 = vector.load %arg4[%c0_3, %c0_4, %c0_5] : memref<3x32x8xf32, #tpu.memory_space<vmem>>, vector<1x32x8xf32>
    %3 = vector.shape_cast %2 : vector<1x32x8xf32> to vector<32x8xf32>
    %c1 = arith.constant 1 : index
    %c0_6 = arith.constant 0 : index
    %c0_7 = arith.constant 0 : index
    %4 = vector.load %arg4[%c1, %c0_6, %c0_7] : memref<3x32x8xf32, #tpu.memory_space<vmem>>, vector<1x32x8xf32>
    %5 = vector.shape_cast %4 : vector<1x32x8xf32> to vector<32x8xf32>
    %c2 = arith.constant 2 : index
    %c0_8 = arith.constant 0 : index
    %c0_9 = arith.constant 0 : index
    %6 = vector.load %arg4[%c2, %c0_8, %c0_9] : memref<3x32x8xf32, #tpu.memory_space<vmem>>, vector<1x32x8xf32>
    %7 = vector.shape_cast %6 : vector<1x32x8xf32> to vector<32x8xf32>
    %c0_10 = arith.constant 0 : index
    %c0_11 = arith.constant 0 : index
    %c0_12 = arith.constant 0 : index
    %8 = vector.load %arg5[%c0_10, %c0_11, %c0_12] : memref<3x8x8xf32, #tpu.memory_space<vmem>>, vector<1x8x8xf32>
    %9 = vector.shape_cast %8 : vector<1x8x8xf32> to vector<8x8xf32>
    %c1_13 = arith.constant 1 : index
    %c0_14 = arith.constant 0 : index
    %c0_15 = arith.constant 0 : index
    %10 = vector.load %arg5[%c1_13, %c0_14, %c0_15] : memref<3x8x8xf32, #tpu.memory_space<vmem>>, vector<1x8x8xf32>
    %11 = vector.shape_cast %10 : vector<1x8x8xf32> to vector<8x8xf32>
    %c2_16 = arith.constant 2 : index
    %c0_17 = arith.constant 0 : index
    %c0_18 = arith.constant 0 : index
    %12 = vector.load %arg5[%c2_16, %c0_17, %c0_18] : memref<3x8x8xf32, #tpu.memory_space<vmem>>, vector<1x8x8xf32>
    %13 = vector.shape_cast %12 : vector<1x8x8xf32> to vector<8x8xf32>
    %c0_19 = arith.constant 0 : index
    %c0_20 = arith.constant 0 : index
    %c0_21 = arith.constant 0 : index
    %14 = vector.load %arg6[%c0_19, %c0_20, %c0_21] : memref<3x1x8xf32, #tpu.memory_space<vmem>>, vector<1x1x8xf32>
    %15 = vector.shape_cast %14 : vector<1x1x8xf32> to vector<1x8xf32>
    %c1_22 = arith.constant 1 : index
    %c0_23 = arith.constant 0 : index
    %c0_24 = arith.constant 0 : index
    %16 = vector.load %arg6[%c1_22, %c0_23, %c0_24] : memref<3x1x8xf32, #tpu.memory_space<vmem>>, vector<1x1x8xf32>
    %17 = vector.shape_cast %16 : vector<1x1x8xf32> to vector<1x8xf32>
    %c2_25 = arith.constant 2 : index
    %c0_26 = arith.constant 0 : index
    %c0_27 = arith.constant 0 : index
    %18 = vector.load %arg6[%c2_25, %c0_26, %c0_27] : memref<3x1x8xf32, #tpu.memory_space<vmem>>, vector<1x1x8xf32>
    %19 = vector.shape_cast %18 : vector<1x1x8xf32> to vector<1x8xf32>
    %c0_28 = arith.constant 0 : index
    %c0_29 = arith.constant 0 : index
    %c0_30 = arith.constant 0 : index
    %20 = vector.load %arg7[%c0_28, %c0_29, %c0_30] : memref<3x1x8xf32, #tpu.memory_space<vmem>>, vector<1x1x8xf32>
    %21 = vector.shape_cast %20 : vector<1x1x8xf32> to vector<1x8xf32>
    %c1_31 = arith.constant 1 : index
    %c0_32 = arith.constant 0 : index
    %c0_33 = arith.constant 0 : index
    %22 = vector.load %arg7[%c1_31, %c0_32, %c0_33] : memref<3x1x8xf32, #tpu.memory_space<vmem>>, vector<1x1x8xf32>
    %23 = vector.shape_cast %22 : vector<1x1x8xf32> to vector<1x8xf32>
    %c2_34 = arith.constant 2 : index
    %c0_35 = arith.constant 0 : index
    %c0_36 = arith.constant 0 : index
    %24 = vector.load %arg7[%c2_34, %c0_35, %c0_36] : memref<3x1x8xf32, #tpu.memory_space<vmem>>, vector<1x1x8xf32>
    %25 = vector.shape_cast %24 : vector<1x1x8xf32> to vector<1x8xf32>
    %c0_37 = arith.constant 0 : index
    %c0_38 = arith.constant 0 : index
    %26 = vector.load %arg1[%c0_37, %c0_38] : memref<2x8xf32, #tpu.memory_space<vmem>>, vector<2x8xf32>
    %c0_39 = arith.constant 0 : index
    %c0_40 = arith.constant 0 : index
    %c0_41 = arith.constant 0 : index
    %27 = vector.load %arg0[%c0_39, %c0_40, %c0_41] : memref<8x2x32xf32, #tpu.memory_space<vmem>>, vector<1x2x32xf32>
    %28 = vector.shape_cast %27 : vector<1x2x32xf32> to vector<2x32xf32>
    %cst = arith.constant dense<0.000000e+00> : vector<2x24xf32>
    %29 = tpu.matmul %28, %0, %cst {dimension_numbers = #tpu.dot_dimension_numbers<[1], [0], [0], [1], [0, 0, 1, 1], [], []>} : vector<2x32xf32>, vector<32x24xf32>, vector<2x24xf32> -> vector<2x24xf32>
    %30 = vector.broadcast %1 : vector<1x24xf32> to vector<2x24xf32>
    %31 = arith.addf %29, %30 : vector<2x24xf32>
    %c0_42 = arith.constant 0 : index
    %c0_43 = arith.constant 0 : index
    %c0_44 = arith.constant 0 : index
    %32 = vector.load %arg8[%c0_42, %c0_43, %c0_44] : memref<8x2x24xf32, #tpu.memory_space<vmem>>, vector<1x2x24xf32>
    %33 = vector.shape_cast %32 : vector<1x2x24xf32> to vector<2x24xf32>
    %34 = vector.shape_cast %31 : vector<2x24xf32> to vector<1x2x24xf32>
    tpu.vector_store %arg8[%c0_42, %c0_43, %c0_44], %34 {strides = array<i32>} : memref<8x2x24xf32, #tpu.memory_space<vmem>>, vector<1x2x24xf32>,
    %cst_45 = arith.constant dense<0.000000e+00> : vector<2x8xf32>
    %35 = tpu.matmul %28, %3, %cst_45 {dimension_numbers = #tpu.dot_dimension_numbers<[1], [0], [0], [1], [0, 0, 1, 1], [], []>} : vector<2x32xf32>, vector<32x8xf32>, vector<2x8xf32> -> vector<2x8xf32>
    %36 = vector.broadcast %15 : vector<1x8xf32> to vector<2x8xf32>
    %37 = arith.addf %35, %36 : vector<2x8xf32>
    %cst_46 = arith.constant dense<0.000000e+00> : vector<2x8xf32>
    %38 = tpu.matmul %28, %5, %cst_46 {dimension_numbers = #tpu.dot_dimension_numbers<[1], [0], [0], [1], [0, 0, 1, 1], [], []>} : vector<2x32xf32>, vector<32x8xf32>, vector<2x8xf32> -> vector<2x8xf32>
    %39 = vector.broadcast %17 : vector<1x8xf32> to vector<2x8xf32>
    %40 = arith.addf %38, %39 : vector<2x8xf32>
    %cst_47 = arith.constant dense<0.000000e+00> : vector<2x8xf32>
    %41 = tpu.matmul %28, %7, %cst_47 {dimension_numbers = #tpu.dot_dimension_numbers<[1], [0], [0], [1], [0, 0, 1, 1], [], []>} : vector<2x32xf32>, vector<32x8xf32>, vector<2x8xf32> -> vector<2x8xf32>
    %42 = vector.broadcast %19 : vector<1x8xf32> to vector<2x8xf32>
    %43 = arith.addf %41, %42 : vector<2x8xf32>
    %cst_48 = arith.constant dense<0.000000e+00> : vector<2x8xf32>
    %44 = tpu.matmul %26, %9, %cst_48 {dimension_numbers = #tpu.dot_dimension_numbers<[1], [0], [0], [1], [0, 0, 1, 1], [], []>} : vector<2x8xf32>, vector<8x8xf32>, vector<2x8xf32> -> vector<2x8xf32>
    %45 = vector.broadcast %21 : vector<1x8xf32> to vector<2x8xf32>
    %46 = arith.addf %44, %45 : vector<2x8xf32>
    %cst_49 = arith.constant dense<0.000000e+00> : vector<2x8xf32>
    %47 = tpu.matmul %26, %11, %cst_49 {dimension_numbers = #tpu.dot_dimension_numbers<[1], [0], [0], [1], [0, 0, 1, 1], [], []>} : vector<2x8xf32>, vector<8x8xf32>, vector<2x8xf32> -> vector<2x8xf32>
    %48 = vector.broadcast %23 : vector<1x8xf32> to vector<2x8xf32>
    %49 = arith.addf %47, %48 : vector<2x8xf32>
    %cst_50 = arith.constant dense<0.000000e+00> : vector<2x8xf32>
    %50 = tpu.matmul %26, %13, %cst_50 {dimension_numbers = #tpu.dot_dimension_numbers<[1], [0], [0], [1], [0, 0, 1, 1], [], []>} : vector<2x8xf32>, vector<8x8xf32>, vector<2x8xf32> -> vector<2x8xf32>
    %51 = vector.broadcast %25 : vector<1x8xf32> to vector<2x8xf32>
    %52 = arith.addf %50, %51 : vector<2x8xf32>
    %53 = arith.addf %37, %46 : vector<2x8xf32>
    %54 = arith.negf %53 : vector<2x8xf32>
    %55 = math.exp %54 : vector<2x8xf32>
    %cst_51 = arith.constant 1.000000e+00 : f32
    %56 = vector.broadcast %cst_51 : f32 to vector<2x8xf32>
    %57 = arith.addf %56, %55 : vector<2x8xf32>
    %58 = arith.divf %56, %57 : vector<2x8xf32>
    %59 = arith.addf %40, %49 : vector<2x8xf32>
    %60 = arith.negf %59 : vector<2x8xf32>
    %61 = math.exp %60 : vector<2x8xf32>
    %cst_52 = arith.constant 1.000000e+00 : f32
    %62 = vector.broadcast %cst_52 : f32 to vector<2x8xf32>
    %63 = arith.addf %62, %61 : vector<2x8xf32>
    %64 = arith.divf %62, %63 : vector<2x8xf32>
    %65 = arith.mulf %58, %52 : vector<2x8xf32>
    %66 = arith.addf %43, %65 : vector<2x8xf32>
    %67 = math.tanh %66 : vector<2x8xf32>
    %cst_53 = arith.constant 1.000000e+00 : f32
    %68 = vector.broadcast %cst_53 : f32 to vector<2x8xf32>
    %69 = arith.subf %68, %64 : vector<2x8xf32>
    %70 = arith.mulf %69, %67 : vector<2x8xf32>
    %71 = arith.mulf %64, %26 : vector<2x8xf32>
    %72 = arith.addf %70, %71 : vector<2x8xf32>
    %c0_54 = arith.constant 0 : index
    %c0_55 = arith.constant 0 : index
    %c0_56 = arith.constant 0 : index
    %73 = vector.load %arg9[%c0_54, %c0_55, %c0_56] : memref<8x2x8xf32, #tpu.memory_space<vmem>>, vector<1x2x8xf32>
    %74 = vector.shape_cast %73 : vector<1x2x8xf32> to vector<2x8xf32>
    %75 = vector.shape_cast %72 : vector<2x8xf32> to vector<1x2x8xf32>
    tpu.vector_store %arg9[%c0_54, %c0_55, %c0_56], %75 {strides = array<i32>} : memref<8x2x8xf32, #tpu.memory_space<vmem>>, vector<1x2x8xf32>,
    %c1_57 = arith.constant 1 : index
    %c0_58 = arith.constant 0 : index
    %c0_59 = arith.constant 0 : index
    %76 = vector.load %arg0[%c1_57, %c0_58, %c0_59] : memref<8x2x32xf32, #tpu.memory_space<vmem>>, vector<1x2x32xf32>
    %77 = vector.shape_cast %76 : vector<1x2x32xf32> to vector<2x32xf32>
    %cst_60 = arith.constant dense<0.000000e+00> : vector<2x24xf32>
    %78 = tpu.matmul %77, %0, %cst_60 {dimension_numbers = #tpu.dot_dimension_numbers<[1], [0], [0], [1], [0, 0, 1, 1], [], []>} : vector<2x32xf32>, vector<32x24xf32>, vector<2x24xf32> -> vector<2x24xf32>
    %79 = vector.broadcast %1 : vector<1x24xf32> to vector<2x24xf32>
    %80 = arith.addf %78, %79 : vector<2x24xf32>
    %c1_61 = arith.constant 1 : index
    %c0_62 = arith.constant 0 : index
    %c0_63 = arith.constant 0 : index
    %81 = vector.load %arg8[%c1_61, %c0_62, %c0_63] : memref<8x2x24xf32, #tpu.memory_space<vmem>>, vector<1x2x24xf32>
    %82 = vector.shape_cast %81 : vector<1x2x24xf32> to vector<2x24xf32>
    %83 = vector.shape_cast %80 : vector<2x24xf32> to vector<1x2x24xf32>
    tpu.vector_store %arg8[%c1_61, %c0_62, %c0_63], %83 {strides = array<i32>} : memref<8x2x24xf32, #tpu.memory_space<vmem>>, vector<1x2x24xf32>,
    %cst_64 = arith.constant dense<0.000000e+00> : vector<2x8xf32>
    %84 = tpu.matmul %77, %3, %cst_64 {dimension_numbers = #tpu.dot_dimension_numbers<[1], [0], [0], [1], [0, 0, 1, 1], [], []>} : vector<2x32xf32>, vector<32x8xf32>, vector<2x8xf32> -> vector<2x8xf32>
    %85 = vector.broadcast %15 : vector<1x8xf32> to vector<2x8xf32>
    %86 = arith.addf %84, %85 : vector<2x8xf32>
    %cst_65 = arith.constant dense<0.000000e+00> : vector<2x8xf32>
    %87 = tpu.matmul %77, %5, %cst_65 {dimension_numbers = #tpu.dot_dimension_numbers<[1], [0], [0], [1], [0, 0, 1, 1], [], []>} : vector<2x32xf32>, vector<32x8xf32>, vector<2x8xf32> -> vector<2x8xf32>
    %88 = vector.broadcast %17 : vector<1x8xf32> to vector<2x8xf32>
    %89 = arith.addf %87, %88 : vector<2x8xf32>
    %cst_66 = arith.constant dense<0.000000e+00> : vector<2x8xf32>
    %90 = tpu.matmul %77, %7, %cst_66 {dimension_numbers = #tpu.dot_dimension_numbers<[1], [0], [0], [1], [0, 0, 1, 1], [], []>} : vector<2x32xf32>, vector<32x8xf32>, vector<2x8xf32> -> vector<2x8xf32>
    %91 = vector.broadcast %19 : vector<1x8xf32> to vector<2x8xf32>
    %92 = arith.addf %90, %91 : vector<2x8xf32>
    %cst_67 = arith.constant dense<0.000000e+00> : vector<2x8xf32>
    %93 = tpu.matmul %72, %9, %cst_67 {dimension_numbers = #tpu.dot_dimension_numbers<[1], [0], [0], [1], [0, 0, 1, 1], [], []>} : vector<2x8xf32>, vector<8x8xf32>, vector<2x8xf32> -> vector<2x8xf32>
    %94 = vector.broadcast %21 : vector<1x8xf32> to vector<2x8xf32>
    %95 = arith.addf %93, %94 : vector<2x8xf32>
    %cst_68 = arith.constant dense<0.000000e+00> : vector<2x8xf32>
    %96 = tpu.matmul %72, %11, %cst_68 {dimension_numbers = #tpu.dot_dimension_numbers<[1], [0], [0], [1], [0, 0, 1, 1], [], []>} : vector<2x8xf32>, vector<8x8xf32>, vector<2x8xf32> -> vector<2x8xf32>
    %97 = vector.broadcast %23 : vector<1x8xf32> to vector<2x8xf32>
    %98 = arith.addf %96, %97 : vector<2x8xf32>
    %cst_69 = arith.constant dense<0.000000e+00> : vector<2x8xf32>
    %99 = tpu.matmul %72, %13, %cst_69 {dimension_numbers = #tpu.dot_dimension_numbers<[1], [0], [0], [1], [0, 0, 1, 1], [], []>} : vector<2x8xf32>, vector<8x8xf32>, vector<2x8xf32> -> vector<2x8xf32>
    %100 = vector.broadcast %25 : vector<1x8xf32> to vector<2x8xf32>
    %101 = arith.addf %99, %100 : vector<2x8xf32>
    %102 = arith.addf %86, %95 : vector<2x8xf32>
    %103 = arith.negf %102 : vector<2x8xf32>
    %104 = math.exp %103 : vector<2x8xf32>
    %cst_70 = arith.constant 1.000000e+00 : f32
    %105 = vector.broadcast %cst_70 : f32 to vector<2x8xf32>
    %106 = arith.addf %105, %104 : vector<2x8xf32>
    %107 = arith.divf %105, %106 : vector<2x8xf32>
    %108 = arith.addf %89, %98 : vector<2x8xf32>
    %109 = arith.negf %108 : vector<2x8xf32>
    %110 = math.exp %109 : vector<2x8xf32>
    %cst_71 = arith.constant 1.000000e+00 : f32
    %111 = vector.broadcast %cst_71 : f32 to vector<2x8xf32>
    %112 = arith.addf %111, %110 : vector<2x8xf32>
    %113 = arith.divf %111, %112 : vector<2x8xf32>
    %114 = arith.mulf %107, %101 : vector<2x8xf32>
    %115 = arith.addf %92, %114 : vector<2x8xf32>
    %116 = math.tanh %115 : vector<2x8xf32>
    %cst_72 = arith.constant 1.000000e+00 : f32
    %117 = vector.broadcast %cst_72 : f32 to vector<2x8xf32>
    %118 = arith.subf %117, %113 : vector<2x8xf32>
    %119 = arith.mulf %118, %116 : vector<2x8xf32>
    %120 = arith.mulf %113, %72 : vector<2x8xf32>
    %121 = arith.addf %119, %120 : vector<2x8xf32>
    %c1_73 = arith.constant 1 : index
    %c0_74 = arith.constant 0 : index
    %c0_75 = arith.constant 0 : index
    %122 = vector.load %arg9[%c1_73, %c0_74, %c0_75] : memref<8x2x8xf32, #tpu.memory_space<vmem>>, vector<1x2x8xf32>
    %123 = vector.shape_cast %122 : vector<1x2x8xf32> to vector<2x8xf32>
    %124 = vector.shape_cast %121 : vector<2x8xf32> to vector<1x2x8xf32>
    tpu.vector_store %arg9[%c1_73, %c0_74, %c0_75], %124 {strides = array<i32>} : memref<8x2x8xf32, #tpu.memory_space<vmem>>, vector<1x2x8xf32>,
    %c2_76 = arith.constant 2 : index
    %c0_77 = arith.constant 0 : index
    %c0_78 = arith.constant 0 : index
    %125 = vector.load %arg0[%c2_76, %c0_77, %c0_78] : memref<8x2x32xf32, #tpu.memory_space<vmem>>, vector<1x2x32xf32>
    %126 = vector.shape_cast %125 : vector<1x2x32xf32> to vector<2x32xf32>
    %cst_79 = arith.constant dense<0.000000e+00> : vector<2x24xf32>
    %127 = tpu.matmul %126, %0, %cst_79 {dimension_numbers = #tpu.dot_dimension_numbers<[1], [0], [0], [1], [0, 0, 1, 1], [], []>} : vector<2x32xf32>, vector<32x24xf32>, vector<2x24xf32> -> vector<2x24xf32>
    %128 = vector.broadcast %1 : vector<1x24xf32> to vector<2x24xf32>
    %129 = arith.addf %127, %128 : vector<2x24xf32>
    %c2_80 = arith.constant 2 : index
    %c0_81 = arith.constant 0 : index
    %c0_82 = arith.constant 0 : index
    %130 = vector.load %arg8[%c2_80, %c0_81, %c0_82] : memref<8x2x24xf32, #tpu.memory_space<vmem>>, vector<1x2x24xf32>
    %131 = vector.shape_cast %130 : vector<1x2x24xf32> to vector<2x24xf32>
    %132 = vector.shape_cast %129 : vector<2x24xf32> to vector<1x2x24xf32>
    tpu.vector_store %arg8[%c2_80, %c0_81, %c0_82], %132 {strides = array<i32>} : memref<8x2x24xf32, #tpu.memory_space<vmem>>, vector<1x2x24xf32>,
    %cst_83 = arith.constant dense<0.000000e+00> : vector<2x8xf32>
    %133 = tpu.matmul %126, %3, %cst_83 {dimension_numbers = #tpu.dot_dimension_numbers<[1], [0], [0], [1], [0, 0, 1, 1], [], []>} : vector<2x32xf32>, vector<32x8xf32>, vector<2x8xf32> -> vector<2x8xf32>
    %134 = vector.broadcast %15 : vector<1x8xf32> to vector<2x8xf32>
    %135 = arith.addf %133, %134 : vector<2x8xf32>
    %cst_84 = arith.constant dense<0.000000e+00> : vector<2x8xf32>
    %136 = tpu.matmul %126, %5, %cst_84 {dimension_numbers = #tpu.dot_dimension_numbers<[1], [0], [0], [1], [0, 0, 1, 1], [], []>} : vector<2x32xf32>, vector<32x8xf32>, vector<2x8xf32> -> vector<2x8xf32>
    %137 = vector.broadcast %17 : vector<1x8xf32> to vector<2x8xf32>
    %138 = arith.addf %136, %137 : vector<2x8xf32>
    %cst_85 = arith.constant dense<0.000000e+00> : vector<2x8xf32>
    %139 = tpu.matmul %126, %7, %cst_85 {dimension_numbers = #tpu.dot_dimension_numbers<[1], [0], [0], [1], [0, 0, 1, 1], [], []>} : vector<2x32xf32>, vector<32x8xf32>, vector<2x8xf32> -> vector<2x8xf32>
    %140 = vector.broadcast %19 : vector<1x8xf32> to vector<2x8xf32>
    %141 = arith.addf %139, %140 : vector<2x8xf32>
    %cst_86 = arith.constant dense<0.000000e+00> : vector<2x8xf32>
    %142 = tpu.matmul %121, %9, %cst_86 {dimension_numbers = #tpu.dot_dimension_numbers<[1], [0], [0], [1], [0, 0, 1, 1], [], []>} : vector<2x8xf32>, vector<8x8xf32>, vector<2x8xf32> -> vector<2x8xf32>
    %143 = vector.broadcast %21 : vector<1x8xf32> to vector<2x8xf32>
    %144 = arith.addf %142, %143 : vector<2x8xf32>
    %cst_87 = arith.constant dense<0.000000e+00> : vector<2x8xf32>
    %145 = tpu.matmul %121, %11, %cst_87 {dimension_numbers = #tpu.dot_dimension_numbers<[1], [0], [0], [1], [0, 0, 1, 1], [], []>} : vector<2x8xf32>, vector<8x8xf32>, vector<2x8xf32> -> vector<2x8xf32>
    %146 = vector.broadcast %23 : vector<1x8xf32> to vector<2x8xf32>
    %147 = arith.addf %145, %146 : vector<2x8xf32>
    %cst_88 = arith.constant dense<0.000000e+00> : vector<2x8xf32>
    %148 = tpu.matmul %121, %13, %cst_88 {dimension_numbers = #tpu.dot_dimension_numbers<[1], [0], [0], [1], [0, 0, 1, 1], [], []>} : vector<2x8xf32>, vector<8x8xf32>, vector<2x8xf32> -> vector<2x8xf32>
    %149 = vector.broadcast %25 : vector<1x8xf32> to vector<2x8xf32>
    %150 = arith.addf %148, %149 : vector<2x8xf32>
    %151 = arith.addf %135, %144 : vector<2x8xf32>
    %152 = arith.negf %151 : vector<2x8xf32>
    %153 = math.exp %152 : vector<2x8xf32>
    %cst_89 = arith.constant 1.000000e+00 : f32
    %154 = vector.broadcast %cst_89 : f32 to vector<2x8xf32>
    %155 = arith.addf %154, %153 : vector<2x8xf32>
    %156 = arith.divf %154, %155 : vector<2x8xf32>
    %157 = arith.addf %138, %147 : vector<2x8xf32>
    %158 = arith.negf %157 : vector<2x8xf32>
    %159 = math.exp %158 : vector<2x8xf32>
    %cst_90 = arith.constant 1.000000e+00 : f32
    %160 = vector.broadcast %cst_90 : f32 to vector<2x8xf32>
    %161 = arith.addf %160, %159 : vector<2x8xf32>
    %162 = arith.divf %160, %161 : vector<2x8xf32>
    %163 = arith.mulf %156, %150 : vector<2x8xf32>
    %164 = arith.addf %141, %163 : vector<2x8xf32>
    %165 = math.tanh %164 : vector<2x8xf32>
    %cst_91 = arith.constant 1.000000e+00 : f32
    %166 = vector.broadcast %cst_91 : f32 to vector<2x8xf32>
    %167 = arith.subf %166, %162 : vector<2x8xf32>
    %168 = arith.mulf %167, %165 : vector<2x8xf32>
    %169 = arith.mulf %162, %121 : vector<2x8xf32>
    %170 = arith.addf %168, %169 : vector<2x8xf32>
    %c2_92 = arith.constant 2 : index
    %c0_93 = arith.constant 0 : index
    %c0_94 = arith.constant 0 : index
    %171 = vector.load %arg9[%c2_92, %c0_93, %c0_94] : memref<8x2x8xf32, #tpu.memory_space<vmem>>, vector<1x2x8xf32>
    %172 = vector.shape_cast %171 : vector<1x2x8xf32> to vector<2x8xf32>
    %173 = vector.shape_cast %170 : vector<2x8xf32> to vector<1x2x8xf32>
    tpu.vector_store %arg9[%c2_92, %c0_93, %c0_94], %173 {strides = array<i32>} : memref<8x2x8xf32, #tpu.memory_space<vmem>>, vector<1x2x8xf32>,
    %c3 = arith.constant 3 : index
    %c0_95 = arith.constant 0 : index
    %c0_96 = arith.constant 0 : index
    %174 = vector.load %arg0[%c3, %c0_95, %c0_96] : memref<8x2x32xf32, #tpu.memory_space<vmem>>, vector<1x2x32xf32>
    %175 = vector.shape_cast %174 : vector<1x2x32xf32> to vector<2x32xf32>
    %cst_97 = arith.constant dense<0.000000e+00> : vector<2x24xf32>
    %176 = tpu.matmul %175, %0, %cst_97 {dimension_numbers = #tpu.dot_dimension_numbers<[1], [0], [0], [1], [0, 0, 1, 1], [], []>} : vector<2x32xf32>, vector<32x24xf32>, vector<2x24xf32> -> vector<2x24xf32>
    %177 = vector.broadcast %1 : vector<1x24xf32> to vector<2x24xf32>
    %178 = arith.addf %176, %177 : vector<2x24xf32>
    %c3_98 = arith.constant 3 : index
    %c0_99 = arith.constant 0 : index
    %c0_100 = arith.constant 0 : index
    %179 = vector.load %arg8[%c3_98, %c0_99, %c0_100] : memref<8x2x24xf32, #tpu.memory_space<vmem>>, vector<1x2x24xf32>
    %180 = vector.shape_cast %179 : vector<1x2x24xf32> to vector<2x24xf32>
    %181 = vector.shape_cast %178 : vector<2x24xf32> to vector<1x2x24xf32>
    tpu.vector_store %arg8[%c3_98, %c0_99, %c0_100], %181 {strides = array<i32>} : memref<8x2x24xf32, #tpu.memory_space<vmem>>, vector<1x2x24xf32>,
    %cst_101 = arith.constant dense<0.000000e+00> : vector<2x8xf32>
    %182 = tpu.matmul %175, %3, %cst_101 {dimension_numbers = #tpu.dot_dimension_numbers<[1], [0], [0], [1], [0, 0, 1, 1], [], []>} : vector<2x32xf32>, vector<32x8xf32>, vector<2x8xf32> -> vector<2x8xf32>
    %183 = vector.broadcast %15 : vector<1x8xf32> to vector<2x8xf32>
    %184 = arith.addf %182, %183 : vector<2x8xf32>
    %cst_102 = arith.constant dense<0.000000e+00> : vector<2x8xf32>
    %185 = tpu.matmul %175, %5, %cst_102 {dimension_numbers = #tpu.dot_dimension_numbers<[1], [0], [0], [1], [0, 0, 1, 1], [], []>} : vector<2x32xf32>, vector<32x8xf32>, vector<2x8xf32> -> vector<2x8xf32>
    %186 = vector.broadcast %17 : vector<1x8xf32> to vector<2x8xf32>
    %187 = arith.addf %185, %186 : vector<2x8xf32>
    %cst_103 = arith.constant dense<0.000000e+00> : vector<2x8xf32>
    %188 = tpu.matmul %175, %7, %cst_103 {dimension_numbers = #tpu.dot_dimension_numbers<[1], [0], [0], [1], [0, 0, 1, 1], [], []>} : vector<2x32xf32>, vector<32x8xf32>, vector<2x8xf32> -> vector<2x8xf32>
    %189 = vector.broadcast %19 : vector<1x8xf32> to vector<2x8xf32>
    %190 = arith.addf %188, %189 : vector<2x8xf32>
    %cst_104 = arith.constant dense<0.000000e+00> : vector<2x8xf32>
    %191 = tpu.matmul %170, %9, %cst_104 {dimension_numbers = #tpu.dot_dimension_numbers<[1], [0], [0], [1], [0, 0, 1, 1], [], []>} : vector<2x8xf32>, vector<8x8xf32>, vector<2x8xf32> -> vector<2x8xf32>
    %192 = vector.broadcast %21 : vector<1x8xf32> to vector<2x8xf32>
    %193 = arith.addf %191, %192 : vector<2x8xf32>
    %cst_105 = arith.constant dense<0.000000e+00> : vector<2x8xf32>
    %194 = tpu.matmul %170, %11, %cst_105 {dimension_numbers = #tpu.dot_dimension_numbers<[1], [0], [0], [1], [0, 0, 1, 1], [], []>} : vector<2x8xf32>, vector<8x8xf32>, vector<2x8xf32> -> vector<2x8xf32>
    %195 = vector.broadcast %23 : vector<1x8xf32> to vector<2x8xf32>
    %196 = arith.addf %194, %195 : vector<2x8xf32>
    %cst_106 = arith.constant dense<0.000000e+00> : vector<2x8xf32>
    %197 = tpu.matmul %170, %13, %cst_106 {dimension_numbers = #tpu.dot_dimension_numbers<[1], [0], [0], [1], [0, 0, 1, 1], [], []>} : vector<2x8xf32>, vector<8x8xf32>, vector<2x8xf32> -> vector<2x8xf32>
    %198 = vector.broadcast %25 : vector<1x8xf32> to vector<2x8xf32>
    %199 = arith.addf %197, %198 : vector<2x8xf32>
    %200 = arith.addf %184, %193 : vector<2x8xf32>
    %201 = arith.negf %200 : vector<2x8xf32>
    %202 = math.exp %201 : vector<2x8xf32>
    %cst_107 = arith.constant 1.000000e+00 : f32
    %203 = vector.broadcast %cst_107 : f32 to vector<2x8xf32>
    %204 = arith.addf %203, %202 : vector<2x8xf32>
    %205 = arith.divf %203, %204 : vector<2x8xf32>
    %206 = arith.addf %187, %196 : vector<2x8xf32>
    %207 = arith.negf %206 : vector<2x8xf32>
    %208 = math.exp %207 : vector<2x8xf32>
    %cst_108 = arith.constant 1.000000e+00 : f32
    %209 = vector.broadcast %cst_108 : f32 to vector<2x8xf32>
    %210 = arith.addf %209, %208 : vector<2x8xf32>
    %211 = arith.divf %209, %210 : vector<2x8xf32>
    %212 = arith.mulf %205, %199 : vector<2x8xf32>
    %213 = arith.addf %190, %212 : vector<2x8xf32>
    %214 = math.tanh %213 : vector<2x8xf32>
    %cst_109 = arith.constant 1.000000e+00 : f32
    %215 = vector.broadcast %cst_109 : f32 to vector<2x8xf32>
    %216 = arith.subf %215, %211 : vector<2x8xf32>
    %217 = arith.mulf %216, %214 : vector<2x8xf32>
    %218 = arith.mulf %211, %170 : vector<2x8xf32>
    %219 = arith.addf %217, %218 : vector<2x8xf32>
    %c3_110 = arith.constant 3 : index
    %c0_111 = arith.constant 0 : index
    %c0_112 = arith.constant 0 : index
    %220 = vector.load %arg9[%c3_110, %c0_111, %c0_112] : memref<8x2x8xf32, #tpu.memory_space<vmem>>, vector<1x2x8xf32>
    %221 = vector.shape_cast %220 : vector<1x2x8xf32> to vector<2x8xf32>
    %222 = vector.shape_cast %219 : vector<2x8xf32> to vector<1x2x8xf32>
    tpu.vector_store %arg9[%c3_110, %c0_111, %c0_112], %222 {strides = array<i32>} : memref<8x2x8xf32, #tpu.memory_space<vmem>>, vector<1x2x8xf32>,
    %c4 = arith.constant 4 : index
    %c0_113 = arith.constant 0 : index
    %c0_114 = arith.constant 0 : index
    %223 = vector.load %arg0[%c4, %c0_113, %c0_114] : memref<8x2x32xf32, #tpu.memory_space<vmem>>, vector<1x2x32xf32>
    %224 = vector.shape_cast %223 : vector<1x2x32xf32> to vector<2x32xf32>
    %cst_115 = arith.constant dense<0.000000e+00> : vector<2x24xf32>
    %225 = tpu.matmul %224, %0, %cst_115 {dimension_numbers = #tpu.dot_dimension_numbers<[1], [0], [0], [1], [0, 0, 1, 1], [], []>} : vector<2x32xf32>, vector<32x24xf32>, vector<2x24xf32> -> vector<2x24xf32>
    %226 = vector.broadcast %1 : vector<1x24xf32> to vector<2x24xf32>
    %227 = arith.addf %225, %226 : vector<2x24xf32>
    %c4_116 = arith.constant 4 : index
    %c0_117 = arith.constant 0 : index
    %c0_118 = arith.constant 0 : index
    %228 = vector.load %arg8[%c4_116, %c0_117, %c0_118] : memref<8x2x24xf32, #tpu.memory_space<vmem>>, vector<1x2x24xf32>
    %229 = vector.shape_cast %228 : vector<1x2x24xf32> to vector<2x24xf32>
    %230 = vector.shape_cast %227 : vector<2x24xf32> to vector<1x2x24xf32>
    tpu.vector_store %arg8[%c4_116, %c0_117, %c0_118], %230 {strides = array<i32>} : memref<8x2x24xf32, #tpu.memory_space<vmem>>, vector<1x2x24xf32>,
    %cst_119 = arith.constant dense<0.000000e+00> : vector<2x8xf32>
    %231 = tpu.matmul %224, %3, %cst_119 {dimension_numbers = #tpu.dot_dimension_numbers<[1], [0], [0], [1], [0, 0, 1, 1], [], []>} : vector<2x32xf32>, vector<32x8xf32>, vector<2x8xf32> -> vector<2x8xf32>
    %232 = vector.broadcast %15 : vector<1x8xf32> to vector<2x8xf32>
    %233 = arith.addf %231, %232 : vector<2x8xf32>
    %cst_120 = arith.constant dense<0.000000e+00> : vector<2x8xf32>
    %234 = tpu.matmul %224, %5, %cst_120 {dimension_numbers = #tpu.dot_dimension_numbers<[1], [0], [0], [1], [0, 0, 1, 1], [], []>} : vector<2x32xf32>, vector<32x8xf32>, vector<2x8xf32> -> vector<2x8xf32>
    %235 = vector.broadcast %17 : vector<1x8xf32> to vector<2x8xf32>
    %236 = arith.addf %234, %235 : vector<2x8xf32>
    %cst_121 = arith.constant dense<0.000000e+00> : vector<2x8xf32>
    %237 = tpu.matmul %224, %7, %cst_121 {dimension_numbers = #tpu.dot_dimension_numbers<[1], [0], [0], [1], [0, 0, 1, 1], [], []>} : vector<2x32xf32>, vector<32x8xf32>, vector<2x8xf32> -> vector<2x8xf32>
    %238 = vector.broadcast %19 : vector<1x8xf32> to vector<2x8xf32>
    %239 = arith.addf %237, %238 : vector<2x8xf32>
    %cst_122 = arith.constant dense<0.000000e+00> : vector<2x8xf32>
    %240 = tpu.matmul %219, %9, %cst_122 {dimension_numbers = #tpu.dot_dimension_numbers<[1], [0], [0], [1], [0, 0, 1, 1], [], []>} : vector<2x8xf32>, vector<8x8xf32>, vector<2x8xf32> -> vector<2x8xf32>
    %241 = vector.broadcast %21 : vector<1x8xf32> to vector<2x8xf32>
    %242 = arith.addf %240, %241 : vector<2x8xf32>
    %cst_123 = arith.constant dense<0.000000e+00> : vector<2x8xf32>
    %243 = tpu.matmul %219, %11, %cst_123 {dimension_numbers = #tpu.dot_dimension_numbers<[1], [0], [0], [1], [0, 0, 1, 1], [], []>} : vector<2x8xf32>, vector<8x8xf32>, vector<2x8xf32> -> vector<2x8xf32>
    %244 = vector.broadcast %23 : vector<1x8xf32> to vector<2x8xf32>
    %245 = arith.addf %243, %244 : vector<2x8xf32>
    %cst_124 = arith.constant dense<0.000000e+00> : vector<2x8xf32>
    %246 = tpu.matmul %219, %13, %cst_124 {dimension_numbers = #tpu.dot_dimension_numbers<[1], [0], [0], [1], [0, 0, 1, 1], [], []>} : vector<2x8xf32>, vector<8x8xf32>, vector<2x8xf32> -> vector<2x8xf32>
    %247 = vector.broadcast %25 : vector<1x8xf32> to vector<2x8xf32>
    %248 = arith.addf %246, %247 : vector<2x8xf32>
    %249 = arith.addf %233, %242 : vector<2x8xf32>
    %250 = arith.negf %249 : vector<2x8xf32>
    %251 = math.exp %250 : vector<2x8xf32>
    %cst_125 = arith.constant 1.000000e+00 : f32
    %252 = vector.broadcast %cst_125 : f32 to vector<2x8xf32>
    %253 = arith.addf %252, %251 : vector<2x8xf32>
    %254 = arith.divf %252, %253 : vector<2x8xf32>
    %255 = arith.addf %236, %245 : vector<2x8xf32>
    %256 = arith.negf %255 : vector<2x8xf32>
    %257 = math.exp %256 : vector<2x8xf32>
    %cst_126 = arith.constant 1.000000e+00 : f32
    %258 = vector.broadcast %cst_126 : f32 to vector<2x8xf32>
    %259 = arith.addf %258, %257 : vector<2x8xf32>
    %260 = arith.divf %258, %259 : vector<2x8xf32>
    %261 = arith.mulf %254, %248 : vector<2x8xf32>
    %262 = arith.addf %239, %261 : vector<2x8xf32>
    %263 = math.tanh %262 : vector<2x8xf32>
    %cst_127 = arith.constant 1.000000e+00 : f32
    %264 = vector.broadcast %cst_127 : f32 to vector<2x8xf32>
    %265 = arith.subf %264, %260 : vector<2x8xf32>
    %266 = arith.mulf %265, %263 : vector<2x8xf32>
    %267 = arith.mulf %260, %219 : vector<2x8xf32>
    %268 = arith.addf %266, %267 : vector<2x8xf32>
    %c4_128 = arith.constant 4 : index
    %c0_129 = arith.constant 0 : index
    %c0_130 = arith.constant 0 : index
    %269 = vector.load %arg9[%c4_128, %c0_129, %c0_130] : memref<8x2x8xf32, #tpu.memory_space<vmem>>, vector<1x2x8xf32>
    %270 = vector.shape_cast %269 : vector<1x2x8xf32> to vector<2x8xf32>
    %271 = vector.shape_cast %268 : vector<2x8xf32> to vector<1x2x8xf32>
    tpu.vector_store %arg9[%c4_128, %c0_129, %c0_130], %271 {strides = array<i32>} : memref<8x2x8xf32, #tpu.memory_space<vmem>>, vector<1x2x8xf32>,
    %c5 = arith.constant 5 : index
    %c0_131 = arith.constant 0 : index
    %c0_132 = arith.constant 0 : index
    %272 = vector.load %arg0[%c5, %c0_131, %c0_132] : memref<8x2x32xf32, #tpu.memory_space<vmem>>, vector<1x2x32xf32>
    %273 = vector.shape_cast %272 : vector<1x2x32xf32> to vector<2x32xf32>
    %cst_133 = arith.constant dense<0.000000e+00> : vector<2x24xf32>
    %274 = tpu.matmul %273, %0, %cst_133 {dimension_numbers = #tpu.dot_dimension_numbers<[1], [0], [0], [1], [0, 0, 1, 1], [], []>} : vector<2x32xf32>, vector<32x24xf32>, vector<2x24xf32> -> vector<2x24xf32>
    %275 = vector.broadcast %1 : vector<1x24xf32> to vector<2x24xf32>
    %276 = arith.addf %274, %275 : vector<2x24xf32>
    %c5_134 = arith.constant 5 : index
    %c0_135 = arith.constant 0 : index
    %c0_136 = arith.constant 0 : index
    %277 = vector.load %arg8[%c5_134, %c0_135, %c0_136] : memref<8x2x24xf32, #tpu.memory_space<vmem>>, vector<1x2x24xf32>
    %278 = vector.shape_cast %277 : vector<1x2x24xf32> to vector<2x24xf32>
    %279 = vector.shape_cast %276 : vector<2x24xf32> to vector<1x2x24xf32>
    tpu.vector_store %arg8[%c5_134, %c0_135, %c0_136], %279 {strides = array<i32>} : memref<8x2x24xf32, #tpu.memory_space<vmem>>, vector<1x2x24xf32>,
    %cst_137 = arith.constant dense<0.000000e+00> : vector<2x8xf32>
    %280 = tpu.matmul %273, %3, %cst_137 {dimension_numbers = #tpu.dot_dimension_numbers<[1], [0], [0], [1], [0, 0, 1, 1], [], []>} : vector<2x32xf32>, vector<32x8xf32>, vector<2x8xf32> -> vector<2x8xf32>
    %281 = vector.broadcast %15 : vector<1x8xf32> to vector<2x8xf32>
    %282 = arith.addf %280, %281 : vector<2x8xf32>
    %cst_138 = arith.constant dense<0.000000e+00> : vector<2x8xf32>
    %283 = tpu.matmul %273, %5, %cst_138 {dimension_numbers = #tpu.dot_dimension_numbers<[1], [0], [0], [1], [0, 0, 1, 1], [], []>} : vector<2x32xf32>, vector<32x8xf32>, vector<2x8xf32> -> vector<2x8xf32>
    %284 = vector.broadcast %17 : vector<1x8xf32> to vector<2x8xf32>
    %285 = arith.addf %283, %284 : vector<2x8xf32>
    %cst_139 = arith.constant dense<0.000000e+00> : vector<2x8xf32>
    %286 = tpu.matmul %273, %7, %cst_139 {dimension_numbers = #tpu.dot_dimension_numbers<[1], [0], [0], [1], [0, 0, 1, 1], [], []>} : vector<2x32xf32>, vector<32x8xf32>, vector<2x8xf32> -> vector<2x8xf32>
    %287 = vector.broadcast %19 : vector<1x8xf32> to vector<2x8xf32>
    %288 = arith.addf %286, %287 : vector<2x8xf32>
    %cst_140 = arith.constant dense<0.000000e+00> : vector<2x8xf32>
    %289 = tpu.matmul %268, %9, %cst_140 {dimension_numbers = #tpu.dot_dimension_numbers<[1], [0], [0], [1], [0, 0, 1, 1], [], []>} : vector<2x8xf32>, vector<8x8xf32>, vector<2x8xf32> -> vector<2x8xf32>
    %290 = vector.broadcast %21 : vector<1x8xf32> to vector<2x8xf32>
    %291 = arith.addf %289, %290 : vector<2x8xf32>
    %cst_141 = arith.constant dense<0.000000e+00> : vector<2x8xf32>
    %292 = tpu.matmul %268, %11, %cst_141 {dimension_numbers = #tpu.dot_dimension_numbers<[1], [0], [0], [1], [0, 0, 1, 1], [], []>} : vector<2x8xf32>, vector<8x8xf32>, vector<2x8xf32> -> vector<2x8xf32>
    %293 = vector.broadcast %23 : vector<1x8xf32> to vector<2x8xf32>
    %294 = arith.addf %292, %293 : vector<2x8xf32>
    %cst_142 = arith.constant dense<0.000000e+00> : vector<2x8xf32>
    %295 = tpu.matmul %268, %13, %cst_142 {dimension_numbers = #tpu.dot_dimension_numbers<[1], [0], [0], [1], [0, 0, 1, 1], [], []>} : vector<2x8xf32>, vector<8x8xf32>, vector<2x8xf32> -> vector<2x8xf32>
    %296 = vector.broadcast %25 : vector<1x8xf32> to vector<2x8xf32>
    %297 = arith.addf %295, %296 : vector<2x8xf32>
    %298 = arith.addf %282, %291 : vector<2x8xf32>
    %299 = arith.negf %298 : vector<2x8xf32>
    %300 = math.exp %299 : vector<2x8xf32>
    %cst_143 = arith.constant 1.000000e+00 : f32
    %301 = vector.broadcast %cst_143 : f32 to vector<2x8xf32>
    %302 = arith.addf %301, %300 : vector<2x8xf32>
    %303 = arith.divf %301, %302 : vector<2x8xf32>
    %304 = arith.addf %285, %294 : vector<2x8xf32>
    %305 = arith.negf %304 : vector<2x8xf32>
    %306 = math.exp %305 : vector<2x8xf32>
    %cst_144 = arith.constant 1.000000e+00 : f32
    %307 = vector.broadcast %cst_144 : f32 to vector<2x8xf32>
    %308 = arith.addf %307, %306 : vector<2x8xf32>
    %309 = arith.divf %307, %308 : vector<2x8xf32>
    %310 = arith.mulf %303, %297 : vector<2x8xf32>
    %311 = arith.addf %288, %310 : vector<2x8xf32>
    %312 = math.tanh %311 : vector<2x8xf32>
    %cst_145 = arith.constant 1.000000e+00 : f32
    %313 = vector.broadcast %cst_145 : f32 to vector<2x8xf32>
    %314 = arith.subf %313, %309 : vector<2x8xf32>
    %315 = arith.mulf %314, %312 : vector<2x8xf32>
    %316 = arith.mulf %309, %268 : vector<2x8xf32>
    %317 = arith.addf %315, %316 : vector<2x8xf32>
    %c5_146 = arith.constant 5 : index
    %c0_147 = arith.constant 0 : index
    %c0_148 = arith.constant 0 : index
    %318 = vector.load %arg9[%c5_146, %c0_147, %c0_148] : memref<8x2x8xf32, #tpu.memory_space<vmem>>, vector<1x2x8xf32>
    %319 = vector.shape_cast %318 : vector<1x2x8xf32> to vector<2x8xf32>
    %320 = vector.shape_cast %317 : vector<2x8xf32> to vector<1x2x8xf32>
    tpu.vector_store %arg9[%c5_146, %c0_147, %c0_148], %320 {strides = array<i32>} : memref<8x2x8xf32, #tpu.memory_space<vmem>>, vector<1x2x8xf32>,
    %c6 = arith.constant 6 : index
    %c0_149 = arith.constant 0 : index
    %c0_150 = arith.constant 0 : index
    %321 = vector.load %arg0[%c6, %c0_149, %c0_150] : memref<8x2x32xf32, #tpu.memory_space<vmem>>, vector<1x2x32xf32>
    %322 = vector.shape_cast %321 : vector<1x2x32xf32> to vector<2x32xf32>
    %cst_151 = arith.constant dense<0.000000e+00> : vector<2x24xf32>
    %323 = tpu.matmul %322, %0, %cst_151 {dimension_numbers = #tpu.dot_dimension_numbers<[1], [0], [0], [1], [0, 0, 1, 1], [], []>} : vector<2x32xf32>, vector<32x24xf32>, vector<2x24xf32> -> vector<2x24xf32>
    %324 = vector.broadcast %1 : vector<1x24xf32> to vector<2x24xf32>
    %325 = arith.addf %323, %324 : vector<2x24xf32>
    %c6_152 = arith.constant 6 : index
    %c0_153 = arith.constant 0 : index
    %c0_154 = arith.constant 0 : index
    %326 = vector.load %arg8[%c6_152, %c0_153, %c0_154] : memref<8x2x24xf32, #tpu.memory_space<vmem>>, vector<1x2x24xf32>
    %327 = vector.shape_cast %326 : vector<1x2x24xf32> to vector<2x24xf32>
    %328 = vector.shape_cast %325 : vector<2x24xf32> to vector<1x2x24xf32>
    tpu.vector_store %arg8[%c6_152, %c0_153, %c0_154], %328 {strides = array<i32>} : memref<8x2x24xf32, #tpu.memory_space<vmem>>, vector<1x2x24xf32>,
    %cst_155 = arith.constant dense<0.000000e+00> : vector<2x8xf32>
    %329 = tpu.matmul %322, %3, %cst_155 {dimension_numbers = #tpu.dot_dimension_numbers<[1], [0], [0], [1], [0, 0, 1, 1], [], []>} : vector<2x32xf32>, vector<32x8xf32>, vector<2x8xf32> -> vector<2x8xf32>
    %330 = vector.broadcast %15 : vector<1x8xf32> to vector<2x8xf32>
    %331 = arith.addf %329, %330 : vector<2x8xf32>
    %cst_156 = arith.constant dense<0.000000e+00> : vector<2x8xf32>
    %332 = tpu.matmul %322, %5, %cst_156 {dimension_numbers = #tpu.dot_dimension_numbers<[1], [0], [0], [1], [0, 0, 1, 1], [], []>} : vector<2x32xf32>, vector<32x8xf32>, vector<2x8xf32> -> vector<2x8xf32>
    %333 = vector.broadcast %17 : vector<1x8xf32> to vector<2x8xf32>
    %334 = arith.addf %332, %333 : vector<2x8xf32>
    %cst_157 = arith.constant dense<0.000000e+00> : vector<2x8xf32>
    %335 = tpu.matmul %322, %7, %cst_157 {dimension_numbers = #tpu.dot_dimension_numbers<[1], [0], [0], [1], [0, 0, 1, 1], [], []>} : vector<2x32xf32>, vector<32x8xf32>, vector<2x8xf32> -> vector<2x8xf32>
    %336 = vector.broadcast %19 : vector<1x8xf32> to vector<2x8xf32>
    %337 = arith.addf %335, %336 : vector<2x8xf32>
    %cst_158 = arith.constant dense<0.000000e+00> : vector<2x8xf32>
    %338 = tpu.matmul %317, %9, %cst_158 {dimension_numbers = #tpu.dot_dimension_numbers<[1], [0], [0], [1], [0, 0, 1, 1], [], []>} : vector<2x8xf32>, vector<8x8xf32>, vector<2x8xf32> -> vector<2x8xf32>
    %339 = vector.broadcast %21 : vector<1x8xf32> to vector<2x8xf32>
    %340 = arith.addf %338, %339 : vector<2x8xf32>
    %cst_159 = arith.constant dense<0.000000e+00> : vector<2x8xf32>
    %341 = tpu.matmul %317, %11, %cst_159 {dimension_numbers = #tpu.dot_dimension_numbers<[1], [0], [0], [1], [0, 0, 1, 1], [], []>} : vector<2x8xf32>, vector<8x8xf32>, vector<2x8xf32> -> vector<2x8xf32>
    %342 = vector.broadcast %23 : vector<1x8xf32> to vector<2x8xf32>
    %343 = arith.addf %341, %342 : vector<2x8xf32>
    %cst_160 = arith.constant dense<0.000000e+00> : vector<2x8xf32>
    %344 = tpu.matmul %317, %13, %cst_160 {dimension_numbers = #tpu.dot_dimension_numbers<[1], [0], [0], [1], [0, 0, 1, 1], [], []>} : vector<2x8xf32>, vector<8x8xf32>, vector<2x8xf32> -> vector<2x8xf32>
    %345 = vector.broadcast %25 : vector<1x8xf32> to vector<2x8xf32>
    %346 = arith.addf %344, %345 : vector<2x8xf32>
    %347 = arith.addf %331, %340 : vector<2x8xf32>
    %348 = arith.negf %347 : vector<2x8xf32>
    %349 = math.exp %348 : vector<2x8xf32>
    %cst_161 = arith.constant 1.000000e+00 : f32
    %350 = vector.broadcast %cst_161 : f32 to vector<2x8xf32>
    %351 = arith.addf %350, %349 : vector<2x8xf32>
    %352 = arith.divf %350, %351 : vector<2x8xf32>
    %353 = arith.addf %334, %343 : vector<2x8xf32>
    %354 = arith.negf %353 : vector<2x8xf32>
    %355 = math.exp %354 : vector<2x8xf32>
    %cst_162 = arith.constant 1.000000e+00 : f32
    %356 = vector.broadcast %cst_162 : f32 to vector<2x8xf32>
    %357 = arith.addf %356, %355 : vector<2x8xf32>
    %358 = arith.divf %356, %357 : vector<2x8xf32>
    %359 = arith.mulf %352, %346 : vector<2x8xf32>
    %360 = arith.addf %337, %359 : vector<2x8xf32>
    %361 = math.tanh %360 : vector<2x8xf32>
    %cst_163 = arith.constant 1.000000e+00 : f32
    %362 = vector.broadcast %cst_163 : f32 to vector<2x8xf32>
    %363 = arith.subf %362, %358 : vector<2x8xf32>
    %364 = arith.mulf %363, %361 : vector<2x8xf32>
    %365 = arith.mulf %358, %317 : vector<2x8xf32>
    %366 = arith.addf %364, %365 : vector<2x8xf32>
    %c6_164 = arith.constant 6 : index
    %c0_165 = arith.constant 0 : index
    %c0_166 = arith.constant 0 : index
    %367 = vector.load %arg9[%c6_164, %c0_165, %c0_166] : memref<8x2x8xf32, #tpu.memory_space<vmem>>, vector<1x2x8xf32>
    %368 = vector.shape_cast %367 : vector<1x2x8xf32> to vector<2x8xf32>
    %369 = vector.shape_cast %366 : vector<2x8xf32> to vector<1x2x8xf32>
    tpu.vector_store %arg9[%c6_164, %c0_165, %c0_166], %369 {strides = array<i32>} : memref<8x2x8xf32, #tpu.memory_space<vmem>>, vector<1x2x8xf32>,
    %c7 = arith.constant 7 : index
    %c0_167 = arith.constant 0 : index
    %c0_168 = arith.constant 0 : index
    %370 = vector.load %arg0[%c7, %c0_167, %c0_168] : memref<8x2x32xf32, #tpu.memory_space<vmem>>, vector<1x2x32xf32>
    %371 = vector.shape_cast %370 : vector<1x2x32xf32> to vector<2x32xf32>
    %cst_169 = arith.constant dense<0.000000e+00> : vector<2x24xf32>
    %372 = tpu.matmul %371, %0, %cst_169 {dimension_numbers = #tpu.dot_dimension_numbers<[1], [0], [0], [1], [0, 0, 1, 1], [], []>} : vector<2x32xf32>, vector<32x24xf32>, vector<2x24xf32> -> vector<2x24xf32>
    %373 = vector.broadcast %1 : vector<1x24xf32> to vector<2x24xf32>
    %374 = arith.addf %372, %373 : vector<2x24xf32>
    %c7_170 = arith.constant 7 : index
    %c0_171 = arith.constant 0 : index
    %c0_172 = arith.constant 0 : index
    %375 = vector.load %arg8[%c7_170, %c0_171, %c0_172] : memref<8x2x24xf32, #tpu.memory_space<vmem>>, vector<1x2x24xf32>
    %376 = vector.shape_cast %375 : vector<1x2x24xf32> to vector<2x24xf32>
    %377 = vector.shape_cast %374 : vector<2x24xf32> to vector<1x2x24xf32>
    tpu.vector_store %arg8[%c7_170, %c0_171, %c0_172], %377 {strides = array<i32>} : memref<8x2x24xf32, #tpu.memory_space<vmem>>, vector<1x2x24xf32>,
    %cst_173 = arith.constant dense<0.000000e+00> : vector<2x8xf32>
    %378 = tpu.matmul %371, %3, %cst_173 {dimension_numbers = #tpu.dot_dimension_numbers<[1], [0], [0], [1], [0, 0, 1, 1], [], []>} : vector<2x32xf32>, vector<32x8xf32>, vector<2x8xf32> -> vector<2x8xf32>
    %379 = vector.broadcast %15 : vector<1x8xf32> to vector<2x8xf32>
    %380 = arith.addf %378, %379 : vector<2x8xf32>
    %cst_174 = arith.constant dense<0.000000e+00> : vector<2x8xf32>
    %381 = tpu.matmul %371, %5, %cst_174 {dimension_numbers = #tpu.dot_dimension_numbers<[1], [0], [0], [1], [0, 0, 1, 1], [], []>} : vector<2x32xf32>, vector<32x8xf32>, vector<2x8xf32> -> vector<2x8xf32>
    %382 = vector.broadcast %17 : vector<1x8xf32> to vector<2x8xf32>
    %383 = arith.addf %381, %382 : vector<2x8xf32>
    %cst_175 = arith.constant dense<0.000000e+00> : vector<2x8xf32>
    %384 = tpu.matmul %371, %7, %cst_175 {dimension_numbers = #tpu.dot_dimension_numbers<[1], [0], [0], [1], [0, 0, 1, 1], [], []>} : vector<2x32xf32>, vector<32x8xf32>, vector<2x8xf32> -> vector<2x8xf32>
    %385 = vector.broadcast %19 : vector<1x8xf32> to vector<2x8xf32>
    %386 = arith.addf %384, %385 : vector<2x8xf32>
    %cst_176 = arith.constant dense<0.000000e+00> : vector<2x8xf32>
    %387 = tpu.matmul %366, %9, %cst_176 {dimension_numbers = #tpu.dot_dimension_numbers<[1], [0], [0], [1], [0, 0, 1, 1], [], []>} : vector<2x8xf32>, vector<8x8xf32>, vector<2x8xf32> -> vector<2x8xf32>
    %388 = vector.broadcast %21 : vector<1x8xf32> to vector<2x8xf32>
    %389 = arith.addf %387, %388 : vector<2x8xf32>
    %cst_177 = arith.constant dense<0.000000e+00> : vector<2x8xf32>
    %390 = tpu.matmul %366, %11, %cst_177 {dimension_numbers = #tpu.dot_dimension_numbers<[1], [0], [0], [1], [0, 0, 1, 1], [], []>} : vector<2x8xf32>, vector<8x8xf32>, vector<2x8xf32> -> vector<2x8xf32>
    %391 = vector.broadcast %23 : vector<1x8xf32> to vector<2x8xf32>
    %392 = arith.addf %390, %391 : vector<2x8xf32>
    %cst_178 = arith.constant dense<0.000000e+00> : vector<2x8xf32>
    %393 = tpu.matmul %366, %13, %cst_178 {dimension_numbers = #tpu.dot_dimension_numbers<[1], [0], [0], [1], [0, 0, 1, 1], [], []>} : vector<2x8xf32>, vector<8x8xf32>, vector<2x8xf32> -> vector<2x8xf32>
    %394 = vector.broadcast %25 : vector<1x8xf32> to vector<2x8xf32>
    %395 = arith.addf %393, %394 : vector<2x8xf32>
    %396 = arith.addf %380, %389 : vector<2x8xf32>
    %397 = arith.negf %396 : vector<2x8xf32>
    %398 = math.exp %397 : vector<2x8xf32>
    %cst_179 = arith.constant 1.000000e+00 : f32
    %399 = vector.broadcast %cst_179 : f32 to vector<2x8xf32>
    %400 = arith.addf %399, %398 : vector<2x8xf32>
    %401 = arith.divf %399, %400 : vector<2x8xf32>
    %402 = arith.addf %383, %392 : vector<2x8xf32>
    %403 = arith.negf %402 : vector<2x8xf32>
    %404 = math.exp %403 : vector<2x8xf32>
    %cst_180 = arith.constant 1.000000e+00 : f32
    %405 = vector.broadcast %cst_180 : f32 to vector<2x8xf32>
    %406 = arith.addf %405, %404 : vector<2x8xf32>
    %407 = arith.divf %405, %406 : vector<2x8xf32>
    %408 = arith.mulf %401, %395 : vector<2x8xf32>
    %409 = arith.addf %386, %408 : vector<2x8xf32>
    %410 = math.tanh %409 : vector<2x8xf32>
    %cst_181 = arith.constant 1.000000e+00 : f32
    %411 = vector.broadcast %cst_181 : f32 to vector<2x8xf32>
    %412 = arith.subf %411, %407 : vector<2x8xf32>
    %413 = arith.mulf %412, %410 : vector<2x8xf32>
    %414 = arith.mulf %407, %366 : vector<2x8xf32>
    %415 = arith.addf %413, %414 : vector<2x8xf32>
    %c7_182 = arith.constant 7 : index
    %c0_183 = arith.constant 0 : index
    %c0_184 = arith.constant 0 : index
    %416 = vector.load %arg9[%c7_182, %c0_183, %c0_184] : memref<8x2x8xf32, #tpu.memory_space<vmem>>, vector<1x2x8xf32>
    %417 = vector.shape_cast %416 : vector<1x2x8xf32> to vector<2x8xf32>
    %418 = vector.shape_cast %415 : vector<2x8xf32> to vector<1x2x8xf32>
    tpu.vector_store %arg9[%c7_182, %c0_183, %c0_184], %418 {strides = array<i32>} : memref<8x2x8xf32, #tpu.memory_space<vmem>>, vector<1x2x8xf32>,
    return
  }
}

</mosaic_0001>

<bundles_post_ra>
// kernel: tpu_custom_call.1
= control target key start
LH: loop header
LB: loop body
LE: loop exit
PB: predicated region body
PF: predicated region fallthrough
CT: control target
= control target key end

     0   :  { %15 = vsyncpa [#allocation3], 0  ;;  %v5263_v2 = vmov 0.0   ;;  %vm75_vm0 = vcmask 261120   ;;  %s6220_s0 = inlined_call_operand.vmem [shape: f32[8,2,32], index: 0, kind: input, shape index: {}]   ;;  %s6221_s1 = inlined_call_operand.vmem [shape: f32[2,8], index: 1, kind: input, shape index: {}]   ;;  %s6222_s2 = inlined_call_operand.vmem [shape: f32[32,24], index: 2, kind: input, shape index: {}]   ;;  %s6223_s3 = inlined_call_operand.vmem [shape: f32[1,24], index: 3, kind: input, shape index: {}]   ;;  %s6224_s4 = inlined_call_operand.vmem [shape: f32[3,32,8], index: 4, kind: input, shape index: {}]   ;;  %s6225_s5 = inlined_call_operand.vmem [shape: f32[3,8,8], index: 5, kind: input, shape index: {}]   ;;  %s6226_s6 = inlined_call_operand.vmem [shape: f32[3,1,8], index: 6, kind: input, shape index: {}]   ;;  %s6227_s7 = inlined_call_operand.vmem [shape: f32[3,1,8], index: 7, kind: input, shape index: {}]   ;;  %s6228_s8 = inlined_call_operand.hbm [shape: f32[8,2,24], index: 8, kind: output, shape index: {0}]   ;;  %s6229_s9 = inlined_call_operand.hbm [shape: f32[8,2,8], index: 9, kind: output, shape index: {1}]  }
   0x1   :  { %v5322_v0 = vld [vmem:[%s6222_s2 + $0x18] sm:$0xff]  ;;  %4635 = vmatprep.subr.mxu0 %v5263_v2  ;;  %4646 = vmatprep.subr.mxu1 %v5263_v2  ;;  %v5334_v3 = vld [vmem:[%s6222_s2 + $0x10] sm:$0xff]  ;;  %v5348_v5 = vld [vmem:[%s6222_s2 + $0x8] sm:$0xff] }
   0x2   :  { %v5327_v1 = vld [vmem:[%s6224_s4 + $0x18] sm:$0xff]  ;;  %v5339_v4 = vld [vmem:[%s6224_s4 + $0x10] sm:$0xff]  ;;  %4636 = vmatpush3.msra.mxu0 %v5322_v0  ;;  %v5353_v6 = vld [vmem:[%s6224_s4 + $0x8] sm:$0xff] }
   0x3   :  { %4647 = vmatpush3.msra.mxu1 %v5327_v1  ;;  %4637 = vmatprep.subr.mxu0 %v5263_v2  ;;  %v5362_v7 = vld [vmem:[%s6222_s2] sm:$0xff] }
   0x4   :  { %4648 = vmatprep.subr.mxu1 %v5263_v2  ;;  %4638 = vmatpush3.msra.mxu0 %v5334_v3  ;;  %v5369_v8 = vld [vmem:[%s6224_s4] sm:$0xff] }
   0x5   :  { %4649 = vmatpush3.msra.mxu1 %v5339_v4  ;;  %4639 = vmatprep.subr.mxu0 %v5263_v2  ;;  %v68_v9 = vld [vmem:[%s6220_s0] sm:$0x3] }
   0x6   :  { %4650 = vmatprep.subr.mxu1 %v5263_v2  ;;  %4640 = vmatpush3.msra.mxu0 %v5348_v5 }
   0x7   :  { %4651 = vmatpush3.msra.mxu1 %v5353_v6  ;;  %4641 = vmatprep.subr.mxu0 %v5263_v2 }
   0x8   :  { %4652 = vmatprep.subr.mxu1 %v5263_v2 }
   0x9   :  { %16 = vsyncpa [#allocation5], 0  ;;  %4642 = vmatpush3.msra.mxu0 %v5362_v7  ;;  %vm5264_vm1 = vmmov 0   ;;  %4653 = vmatpush3.msra.mxu1 %v5369_v8  ;;  %v5384_v10 = vld [vmem:[%s6224_s4 + $0x38] sm:$0xff]  ;;  %v5399_v12 = vld [vmem:[%s6224_s4 + $0x30] sm:$0xff]  ;;  %vm385_vm2 = vcmask 64512  }
   0xa   :  { %4643 = vmatprep.mubr.msk.f32.mxu0 %vm5264_vm1, %v5263_v2  ;;  %v5389_v11 = vld [vmem:[%s6224_s4 + $0x58] sm:$0xff]  ;;  %4654 = vmatprep.mubr.msk.f32.mxu1 %vm5264_vm1, %v5263_v2  ;;  %v5404_v13 = vld [vmem:[%s6224_s4 + $0x50] sm:$0xff]  ;;  %v5413_v14 = vld [vmem:[%s6224_s4 + $0x28] sm:$0xff]  ;;  %vm149_vm3 = vcmask 189440   ;;  %vm632_vm4 = vcmask 58368  }
   0xb   :  { %4644 = vmatmul.mubr.msk.f32.vlgmr.msra.gmra.mxu0 %vm75_vm0, %v68_v9  ;;  %4657 = vmatprep.subr.mxu0 %v5263_v2  ;;  %v5418_v15 = vld [vmem:[%s6224_s4 + $0x48] sm:$0xff]  ;;  %v5427_v16 = vld [vmem:[%s6224_s4 + $0x20] sm:$0xff]  ;;  %v5472_v21 = vld [vmem:[%s6225_s5 + $0x10] sm:$0xff] }
   0xc   :  { %4668 = vmatprep.subr.mxu1 %v5263_v2  ;;  %4655 = vmatmul.mubr.msk.f32.vlgmr.msra.gmra.mxu1 %vm75_vm0, %v68_v9  ;;  %v5434_v17 = vld [vmem:[%s6224_s4 + $0x40] sm:$0xff]  ;;  %v5454_v19 = vld [vmem:[%s6225_s5 + $0x8] sm:$0xff] }
   0xd   :  { %4658 = vmatpush3.msra.mxu0 %v5384_v10  ;;  %4669 = vmatpush3.msra.mxu1 %v5389_v11  ;;  %v5447_v18 = vld [vmem:[%s6225_s5] sm:$0xff] }
   0xe   :  { %4659 = vmatprep.subr.mxu0 %v5263_v2  ;;  %4670 = vmatprep.subr.mxu1 %v5263_v2  ;;  %v5461_v20 = vld [vmem:[%s6221_s1] sm:$0x3]  ;;  %v4357_v22 = vld [vmem:[%s6220_s0 + $0x2] sm:$0x3] }
   0xf   :  { %4660 = vmatpush3.msra.mxu0 %v5399_v12  ;;  %4671 = vmatpush3.msra.mxu1 %v5404_v13  ;;  %v5544_v23 = vld [vmem:[%s6223_s3] ss:$0 sm:$0xff]  ;;  %v5563_v39 = vld [vmem:[%s6227_s7 + $0x1] ss:$0 sm:$0xff]  ;;  %v5575_v54 = vld [vmem:[%s6227_s7 + $0x2] ss:$0 sm:$0xff] }
  0x10   :  { %4661 = vmatprep.subr.mxu0 %v5263_v2  ;;  %4672 = vmatprep.subr.mxu1 %v5263_v2  ;;  %v5551_v29 = vld [vmem:[%s6226_s6] ss:$0 sm:$0xff]  ;;  %v5568_v43 = vld [vmem:[%s6226_s6 + $0x1] ss:$0 sm:$0xff]  ;;  %v5581_v57 = vld [vmem:[%s6226_s6 + $0x2] ss:$0 sm:$0xff] }
  0x11   :  { %4662 = vmatpush3.msra.mxu0 %v5413_v14  ;;  %4673 = vmatpush3.msra.mxu1 %v5418_v15  ;;  %v5556_v34 = vld [vmem:[%s6227_s7] ss:$0 sm:$0xff] }
  0x12   :  { %4663 = vmatprep.subr.mxu0 %v5263_v2  ;;  %4674 = vmatprep.subr.mxu1 %v5263_v2 }
  0x13   :  { %4664 = vmatpush3.msra.mxu0 %v5427_v16  ;;  %4665 = vmatprep.mubr.msk.f32.mxu0 %vm5264_vm1, %v5263_v2 }
  0x14   :  { %4675 = vmatpush3.msra.mxu1 %v5434_v17  ;;  %4676 = vmatprep.mubr.msk.f32.mxu1 %vm5264_vm1, %v5263_v2 }
  0x15   :  { %4666 = vmatmul.mubr.msk.f32.vlgmr.msra.gmra.mxu0 %vm75_vm0, %v68_v9  ;;  %4677 = vmatmul.mubr.msk.f32.vlgmr.msra.gmra.mxu1 %vm75_vm0, %v68_v9 }
  0x16   :  { %4679 = vmatprep.subr.mxu0 %v5263_v2  ;;  %4684 = vmatprep.subr.mxu1 %v5263_v2 }
  0x17   :  { %4680 = vmatpush3.msra.mxu0 %v5447_v18  ;;  %4681 = vmatprep.mubr.msk.f32.mxu0 %vm5264_vm1, %v5263_v2 }
  0x18   :  { %4685 = vmatpush3.msra.mxu1 %v5454_v19  ;;  %4686 = vmatprep.mubr.msk.f32.mxu1 %vm5264_vm1, %v5263_v2 }
  0x19   :  { %4682 = vmatmul.mubr.msk.f32.vlgmr.msra.gmra.mxu0 %vm385_vm2, %v5461_v20  ;;  %4687 = vmatmul.mubr.msk.f32.vlgmr.msra.gmra.mxu1 %vm385_vm2, %v5461_v20 }
  0x1a   :  { %4689 = vmatprep.subr.mxu0 %v5263_v2  ;;  %4691 = vmatprep.mubr.msk.f32.mxu0 %vm5264_vm1, %v5263_v2 }
  0x1b   :  { %4690 = vmatpush3.msra.mxu0 %v5472_v21  ;;  %4694 = vmatprep.subr.mxu1 %v5263_v2 }
  0x1c   :  { %4695 = vmatpush3.msra.mxu1 %v5322_v0  ;;  %4705 = vmatprep.subr.mxu0 %v5263_v2 }
  0x1d   :  { %4692 = vmatmul.mubr.msk.f32.vlgmr.msra.gmra.mxu0 %vm385_vm2, %v5461_v20  ;;  %4696 = vmatprep.subr.mxu1 %v5263_v2 }
  0x1e   :  { %4706 = vmatpush3.msra.mxu0 %v5327_v1  ;;  %4697 = vmatpush3.msra.mxu1 %v5334_v3 }
  0x1f   :  { %4707 = vmatprep.subr.mxu0 %v5263_v2  ;;  %4698 = vmatprep.subr.mxu1 %v5263_v2 }
  0x20   :  { %4708 = vmatpush3.msra.mxu0 %v5339_v4  ;;  %4699 = vmatpush3.msra.mxu1 %v5348_v5 }
  0x21   :  { %4709 = vmatprep.subr.mxu0 %v5263_v2  ;;  %4700 = vmatprep.subr.mxu1 %v5263_v2 }
  0x22   :  { %4710 = vmatpush3.msra.mxu0 %v5353_v6  ;;  %4701 = vmatpush3.msra.mxu1 %v5362_v7 }
  0x23   :  { %4702 = vmatprep.mubr.msk.f32.mxu1 %vm5264_vm1, %v5263_v2  ;;  %4711 = vmatprep.subr.mxu0 %v5263_v2 }
  0x24   :  { %4712 = vmatpush3.msra.mxu0 %v5369_v8  ;;  %4716 = vmatprep.subr.mxu1 %v5263_v2 }
  0x25   :  { %4713 = vmatprep.mubr.msk.f32.mxu0 %vm5264_vm1, %v5263_v2  ;;  %4727 = vmatprep.subr.mxu0 %v5263_v2 }
  0x26   :  { %4703 = vmatmul.mubr.msk.f32.vlgmr.msra.gmra.mxu1 %vm75_vm0, %v4357_v22  ;;  %4714 = vmatmul.mubr.msk.f32.vlgmr.msra.gmra.mxu0 %vm75_vm0, %v4357_v22 }
  0x27   :  { %4717 = vmatpush3.msra.mxu1 %v5384_v10  ;;  %4728 = vmatpush3.msra.mxu0 %v5389_v11 }
  0x28   :  { %4718 = vmatprep.subr.mxu1 %v5263_v2  ;;  %4729 = vmatprep.subr.mxu0 %v5263_v2 }
  0x29   :  { %4719 = vmatpush3.msra.mxu1 %v5399_v12  ;;  %4730 = vmatpush3.msra.mxu0 %v5404_v13 }
  0x2a   :  { %4720 = vmatprep.subr.mxu1 %v5263_v2  ;;  %4731 = vmatprep.subr.mxu0 %v5263_v2 }
  0x2b   :  { %4721 = vmatpush3.msra.mxu1 %v5413_v14  ;;  %4732 = vmatpush3.msra.mxu0 %v5418_v15 }
  0x2c   :  { %4722 = vmatprep.subr.mxu1 %v5263_v2  ;;  %4724 = vmatprep.mubr.msk.f32.mxu1 %vm5264_vm1, %v5263_v2 }
  0x2d   :  { %4723 = vmatpush3.msra.mxu1 %v5427_v16  ;;  %4733 = vmatprep.subr.mxu0 %v5263_v2 }
  0x2e   :  { %4725 = vmatmul.mubr.msk.f32.vlgmr.msra.gmra.mxu1 %vm75_vm0, %v4357_v22  ;;  %4734 = vmatpush3.msra.mxu0 %v5434_v17 }
  0x2f   :  { %4735 = vmatprep.mubr.msk.f32.mxu0 %vm5264_vm1, %v5263_v2  ;;  %4738 = vmatprep.subr.mxu1 %v5263_v2 }
  0x30   :  { %4736 = vmatmul.mubr.msk.f32.vlgmr.msra.gmra.mxu0 %vm75_vm0, %v4357_v22  ;;  %4739 = vmatpush3.msra.mxu1 %v5447_v18 }
  0x31   :  { %4743 = vmatprep.subr.mxu0 %v5263_v2  ;;  %4740 = vmatprep.mubr.msk.f32.mxu1 %vm5264_vm1, %v5263_v2 }
  0x32   :  { %4744 = vmatpush3.msra.mxu0 %v5454_v19  ;;  %4745 = vmatprep.mubr.msk.f32.mxu0 %vm5264_vm1, %v5263_v2 }
  0x33   :  { %4748 = vmatprep.subr.mxu1 %v5263_v2  ;;  %4753 = vmatprep.subr.mxu0 %v5263_v2 }
  0xcb   :  { %v145_v24 = vpop.f32.mrf.mxu0 }
  0xcc   :  { %v146_v25 = vadd.f32 %v5544_v23, %v145_v24  ;;  %v223_v27 = vpop.f32.mrf.mxu1 }
  0xcd   :  { %v4645_v26 = vpop.f32.mrf.mxu0  ;;  %v224_v35 = vadd.f32 %v5551_v29, %v223_v27 }
  0xce   :  { %150 = vst.msk [vmem:[#allocation2] sm:$0x3] %vm149_vm3, %v146_v25  ;;  %v4656_v28 = vpop.f32.mrf.mxu1 }
  0xd5   :  { %v299_v30 = vpop.f32.mrf.mxu0  ;;  %v375_v31 = vpop.f32.mrf.mxu1 }
  0xd6   :  { %v300_v48 = vadd.f32 %v5568_v43, %v299_v30  ;;  %v376_v59 = vadd.f32 %v5581_v57, %v375_v31 }
  0xd7   :  { %v4667_v32 = vpop.f32.mrf.mxu0  ;;  %v4678_v33 = vpop.f32.mrf.mxu1 }
  0xd9   :  { %v455_v36 = vpop.f32.mrf.mxu0  ;;  %v531_v37 = vpop.f32.mrf.mxu1 }
  0xda   :  { %v456_v38 = vadd.f32 %v5556_v34, %v455_v36  ;;  %v532_v46 = vadd.f32 %v5563_v39, %v531_v37  ;;  %v4367_v36 = vld [vmem:[%s6220_s0 + $0x4] sm:$0x3] }
  0xdb   :  { %v4683_v40 = vpop.f32.mrf.mxu0  ;;  %v4688_v41 = vpop.f32.mrf.mxu1 }
  0xdc   :  { %v611_v42 = vadd.f32 %v456_v38, %v224_v35  ;;  %v618_v49 = vadd.f32 %v532_v46, %v300_v48 }
  0xdd   :  { %v607_v44 = vpop.f32.mrf.mxu0 }
  0xde   :  { %v4355_v45 = vmul.f32 -1.442695, %v611_v42  ;;  %v4356_v50 = vmul.f32 -1.442695, %v618_v49  ;;  %v608_v56 = vadd.f32 %v5575_v54, %v607_v44 }
  0xdf   :  { %v4693_v47 = vpop.f32.mrf.mxu0 }
  0xe0   :  { %5113 = vpow2.f32 %v4355_v45 }
  0xe1   :  { %5115 = vpow2.f32 %v4356_v50 }
  0xe6   :  { %v777_v26 = vpop.f32.mrf.mxu0 }
  0xe7   :  { %v778_v37 = vadd.f32 %v5551_v29, %v777_v26 }
  0xe8   :  { %v4715_v30 = vpop.f32.mrf.mxu0 }
  0xed   :  { %v5114_v51 = vpop.eup %5113 }
  0xee   :  { %v615_v52 = vadd.f32 1.0, %v5114_v51  ;;  %v5116_v53 = vpop.eup %5115 }
  0xef   :  { %v622_v55 = vadd.f32 1.0, %v5116_v53 }
  0xf0   :  { %5117 = vrcp.f32 %v615_v52  ;;  %v917_v32 = vpop.f32.mrf.mxu0 }
  0xf1   :  { %5119 = vrcp.f32 %v622_v55 }
  0xf2   :  { %v4737_v35 = vpop.f32.mrf.mxu0 }
  0xfd   :  { %v5118_v58 = vpop.eup %5117 }
  0xfe   :  { %v625_v60 = vmul.f32 %v5118_v58, %v608_v56  ;;  %v5120_v62 = vpop.eup %5119 }
  0xff   :  { %v628_v63 = vsub.f32 1.0, %v5120_v62  ;;  %v630_v24 = vmul.f32 %v5120_v62, %v5461_v20  ;;  %v705_v20 = vpop.f32.mrf.mxu1 }
 0x100   :  { %v626_v61 = vadd.f32 %v625_v60, %v376_v59  ;;  %v706_v27 = vadd.f32 %v5544_v23, %v705_v20 }
 0x101   :  { %v4704_v28 = vpop.f32.mrf.mxu1 }
 0x102   :  { %5121 = vtanh.f32 %v626_v61  ;;  %710 = vst.msk [vmem:[#allocation2 + $0x2] sm:$0x3] %vm149_vm3, %v706_v27  ;;  %v918_v61 = vadd.f32 %v5581_v57, %v917_v32 }
 0x103   :  { %v847_v31 = vpop.f32.mrf.mxu1 }
 0x104   :  { %v848_v50 = vadd.f32 %v5568_v43, %v847_v31 }
 0x105   :  { %v4726_v33 = vpop.f32.mrf.mxu1 }
 0x10f   :  { %v5122_v9 = vpop.eup %5121 }
 0x110   :  { %v629_v22 = vmul.f32 %v5122_v9, %v628_v63 }
 0x112   :  { %v5585_v25 = vadd.f32 %v630_v24, %v629_v22 }
 0x114   :  { %633 = vst.msk [vmem:[#allocation4] sm:$0x3] %vm632_vm4, %v5585_v25  ;;  %4741 = vmatmul.mubr.msk.f32.vlgmr.msra.gmra.mxu1 %vm385_vm2, %v5585_v25  ;;  %4746 = vmatmul.mubr.msk.f32.vlgmr.msra.gmra.mxu0 %vm385_vm2, %v5585_v25 }
 0x115   :  { %4749 = vmatpush3.msra.mxu1 %v5472_v21  ;;  %4750 = vmatprep.mubr.msk.f32.mxu1 %vm5264_vm1, %v5263_v2 }
 0x116   :  { %4754 = vmatpush3.msra.mxu0 %v5322_v0  ;;  %4764 = vmatprep.subr.mxu1 %v5263_v2 }
 0x117   :  { %4755 = vmatprep.subr.mxu0 %v5263_v2  ;;  %4761 = vmatprep.mubr.msk.f32.mxu0 %vm5264_vm1, %v5263_v2 }
 0x118   :  { %4751 = vmatmul.mubr.msk.f32.vlgmr.msra.gmra.mxu1 %vm385_vm2, %v5585_v25  ;;  %4756 = vmatpush3.msra.mxu0 %v5334_v3 }
 0x119   :  { %4765 = vmatpush3.msra.mxu1 %v5327_v1  ;;  %4757 = vmatprep.subr.mxu0 %v5263_v2 }
 0x11a   :  { %4766 = vmatprep.subr.mxu1 %v5263_v2  ;;  %4758 = vmatpush3.msra.mxu0 %v5348_v5 }
 0x11b   :  { %4767 = vmatpush3.msra.mxu1 %v5339_v4  ;;  %4759 = vmatprep.subr.mxu0 %v5263_v2 }
 0x11c   :  { %4768 = vmatprep.subr.mxu1 %v5263_v2  ;;  %4760 = vmatpush3.msra.mxu0 %v5362_v7 }
 0x11d   :  { %4769 = vmatpush3.msra.mxu1 %v5353_v6  ;;  %4775 = vmatprep.subr.mxu0 %v5263_v2 }
 0x11e   :  { %4770 = vmatprep.subr.mxu1 %v5263_v2  ;;  %4772 = vmatprep.mubr.msk.f32.mxu1 %vm5264_vm1, %v5263_v2 }
 0x11f   :  { %4771 = vmatpush3.msra.mxu1 %v5369_v8  ;;  %4762 = vmatmul.mubr.msk.f32.vlgmr.msra.gmra.mxu0 %vm75_vm0, %v4367_v36 }
 0x120   :  { %4786 = vmatprep.subr.mxu1 %v5263_v2  ;;  %4773 = vmatmul.mubr.msk.f32.vlgmr.msra.gmra.mxu1 %vm75_vm0, %v4367_v36 }
 0x121   :  { %4776 = vmatpush3.msra.mxu0 %v5384_v10  ;;  %4787 = vmatpush3.msra.mxu1 %v5389_v11 }
 0x122   :  { %4777 = vmatprep.subr.mxu0 %v5263_v2  ;;  %4788 = vmatprep.subr.mxu1 %v5263_v2 }
 0x123   :  { %4778 = vmatpush3.msra.mxu0 %v5399_v12  ;;  %4789 = vmatpush3.msra.mxu1 %v5404_v13 }
 0x124   :  { %4779 = vmatprep.subr.mxu0 %v5263_v2  ;;  %4790 = vmatprep.subr.mxu1 %v5263_v2 }
 0x125   :  { %4780 = vmatpush3.msra.mxu0 %v5413_v14  ;;  %4791 = vmatpush3.msra.mxu1 %v5418_v15 }
 0x126   :  { %4781 = vmatprep.subr.mxu0 %v5263_v2  ;;  %4783 = vmatprep.mubr.msk.f32.mxu0 %vm5264_vm1, %v5263_v2 }
 0x127   :  { %4782 = vmatpush3.msra.mxu0 %v5427_v16  ;;  %4792 = vmatprep.subr.mxu1 %v5263_v2 }
 0x128   :  { %4784 = vmatmul.mubr.msk.f32.vlgmr.msra.gmra.mxu0 %vm75_vm0, %v4367_v36  ;;  %4793 = vmatpush3.msra.mxu1 %v5434_v17 }
 0x129   :  { %4794 = vmatprep.mubr.msk.f32.mxu1 %vm5264_vm1, %v5263_v2  ;;  %4797 = vmatprep.subr.mxu0 %v5263_v2 }
 0x12a   :  { %4795 = vmatmul.mubr.msk.f32.vlgmr.msra.gmra.mxu1 %vm75_vm0, %v4367_v36  ;;  %4798 = vmatpush3.msra.mxu0 %v5447_v18 }
 0x12b   :  { %4802 = vmatprep.subr.mxu1 %v5263_v2  ;;  %4799 = vmatprep.mubr.msk.f32.mxu0 %vm5264_vm1, %v5263_v2 }
 0x12c   :  { %4803 = vmatpush3.msra.mxu1 %v5454_v19  ;;  %4804 = vmatprep.mubr.msk.f32.mxu1 %vm5264_vm1, %v5263_v2 }
 0x12d   :  { %4807 = vmatprep.subr.mxu0 %v5263_v2  ;;  %4812 = vmatprep.subr.mxu1 %v5263_v2 }
 0x1d4   :  { %v990_v38 = vpop.f32.mrf.mxu1  ;;  %v1060_v40 = vpop.f32.mrf.mxu0 }
 0x1d5   :  { %v991_v41 = vadd.f32 %v5556_v34, %v990_v38  ;;  %v1061_v48 = vadd.f32 %v5563_v39, %v1060_v40  ;;  %v4377_v38 = vld [vmem:[%s6220_s0 + $0x6] sm:$0x3] }
 0x1d6   :  { %v4742_v42 = vpop.f32.mrf.mxu1  ;;  %v4747_v44 = vpop.f32.mrf.mxu0 }
 0x1d7   :  { %v1134_v45 = vadd.f32 %v991_v41, %v778_v37  ;;  %v1141_v51 = vadd.f32 %v1061_v48, %v848_v50 }
 0x1d8   :  { %v1130_v46 = vpop.f32.mrf.mxu1 }
 0x1d9   :  { %v4365_v47 = vmul.f32 -1.442695, %v1134_v45  ;;  %v4366_v52 = vmul.f32 -1.442695, %v1141_v51  ;;  %v1131_v59 = vadd.f32 %v5575_v54, %v1130_v46 }
 0x1da   :  { %v4752_v49 = vpop.f32.mrf.mxu1 }
 0x1db   :  { %5123 = vpow2.f32 %v4365_v47 }
 0x1dc   :  { %5125 = vpow2.f32 %v4366_v52 }
 0x1e0   :  { %v1300_v28 = vpop.f32.mrf.mxu1 }
 0x1e1   :  { %v1301_v40 = vadd.f32 %v5551_v29, %v1300_v28 }
 0x1e2   :  { %v4774_v32 = vpop.f32.mrf.mxu1 }
 0x1e8   :  { %v5124_v53 = vpop.eup %5123 }
 0x1e9   :  { %v1138_v55 = vadd.f32 1.0, %v5124_v53  ;;  %v5126_v56 = vpop.eup %5125 }
 0x1ea   :  { %v1145_v58 = vadd.f32 1.0, %v5126_v56  ;;  %v1440_v35 = vpop.f32.mrf.mxu1 }
 0x1eb   :  { %5127 = vrcp.f32 %v1138_v55 }
 0x1ec   :  { %5129 = vrcp.f32 %v1145_v58  ;;  %v4796_v37 = vpop.f32.mrf.mxu1 }
 0x1f8   :  { %v5128_v60 = vpop.eup %5127 }
 0x1f9   :  { %v1148_v62 = vmul.f32 %v5128_v60, %v1131_v59  ;;  %v5130_v9 = vpop.eup %5129 }
 0x1fa   :  { %v1151_v22 = vsub.f32 1.0, %v5130_v9  ;;  %v1153_v26 = vmul.f32 %v5130_v9, %v5585_v25  ;;  %v1228_v25 = vpop.f32.mrf.mxu0 }
 0x1fb   :  { %v1149_v63 = vadd.f32 %v1148_v62, %v918_v61  ;;  %v1229_v30 = vadd.f32 %v5544_v23, %v1228_v25 }
 0x1fc   :  { %v4763_v31 = vpop.f32.mrf.mxu0 }
 0x1fd   :  { %5131 = vtanh.f32 %v1149_v63  ;;  %1233 = vst.msk [vmem:[#allocation2 + $0x4] sm:$0x3] %vm149_vm3, %v1229_v30  ;;  %v1441_v63 = vadd.f32 %v5581_v57, %v1440_v35 }
 0x1fe   :  { %v1370_v33 = vpop.f32.mrf.mxu0 }
 0x1ff   :  { %v1371_v52 = vadd.f32 %v5568_v43, %v1370_v33 }
 0x200   :  { %v4785_v36 = vpop.f32.mrf.mxu0 }
 0x20a   :  { %v5132_v24 = vpop.eup %5131 }
 0x20b   :  { %v1152_v20 = vmul.f32 %v5132_v24, %v1151_v22 }
 0x20d   :  { %v5663_v27 = vadd.f32 %v1153_v26, %v1152_v20 }
 0x20f   :  { %1156 = vst.msk [vmem:[#allocation4 + $0x2] sm:$0x3] %vm632_vm4, %v5663_v27  ;;  %4800 = vmatmul.mubr.msk.f32.vlgmr.msra.gmra.mxu0 %vm385_vm2, %v5663_v27  ;;  %4805 = vmatmul.mubr.msk.f32.vlgmr.msra.gmra.mxu1 %vm385_vm2, %v5663_v27 }
 0x210   :  { %4808 = vmatpush3.msra.mxu0 %v5472_v21  ;;  %4809 = vmatprep.mubr.msk.f32.mxu0 %vm5264_vm1, %v5263_v2 }
 0x211   :  { %4813 = vmatpush3.msra.mxu1 %v5322_v0  ;;  %4823 = vmatprep.subr.mxu0 %v5263_v2 }
 0x212   :  { %4814 = vmatprep.subr.mxu1 %v5263_v2  ;;  %4820 = vmatprep.mubr.msk.f32.mxu1 %vm5264_vm1, %v5263_v2 }
 0x213   :  { %4810 = vmatmul.mubr.msk.f32.vlgmr.msra.gmra.mxu0 %vm385_vm2, %v5663_v27  ;;  %4815 = vmatpush3.msra.mxu1 %v5334_v3 }
 0x214   :  { %4824 = vmatpush3.msra.mxu0 %v5327_v1  ;;  %4816 = vmatprep.subr.mxu1 %v5263_v2 }
 0x215   :  { %4825 = vmatprep.subr.mxu0 %v5263_v2  ;;  %4817 = vmatpush3.msra.mxu1 %v5348_v5 }
 0x216   :  { %4826 = vmatpush3.msra.mxu0 %v5339_v4  ;;  %4818 = vmatprep.subr.mxu1 %v5263_v2 }
 0x217   :  { %4827 = vmatprep.subr.mxu0 %v5263_v2  ;;  %4819 = vmatpush3.msra.mxu1 %v5362_v7 }
 0x218   :  { %4828 = vmatpush3.msra.mxu0 %v5353_v6  ;;  %4834 = vmatprep.subr.mxu1 %v5263_v2 }
 0x219   :  { %4829 = vmatprep.subr.mxu0 %v5263_v2  ;;  %4831 = vmatprep.mubr.msk.f32.mxu0 %vm5264_vm1, %v5263_v2 }
 0x21a   :  { %4830 = vmatpush3.msra.mxu0 %v5369_v8  ;;  %4821 = vmatmul.mubr.msk.f32.vlgmr.msra.gmra.mxu1 %vm75_vm0, %v4377_v38 }
 0x21b   :  { %4845 = vmatprep.subr.mxu0 %v5263_v2  ;;  %4832 = vmatmul.mubr.msk.f32.vlgmr.msra.gmra.mxu0 %vm75_vm0, %v4377_v38 }
 0x21c   :  { %4835 = vmatpush3.msra.mxu1 %v5384_v10  ;;  %4846 = vmatpush3.msra.mxu0 %v5389_v11 }
 0x21d   :  { %4836 = vmatprep.subr.mxu1 %v5263_v2  ;;  %4847 = vmatprep.subr.mxu0 %v5263_v2 }
 0x21e   :  { %4837 = vmatpush3.msra.mxu1 %v5399_v12  ;;  %4848 = vmatpush3.msra.mxu0 %v5404_v13 }
 0x21f   :  { %4838 = vmatprep.subr.mxu1 %v5263_v2  ;;  %4849 = vmatprep.subr.mxu0 %v5263_v2 }
 0x220   :  { %4839 = vmatpush3.msra.mxu1 %v5413_v14  ;;  %4850 = vmatpush3.msra.mxu0 %v5418_v15 }
 0x221   :  { %4840 = vmatprep.subr.mxu1 %v5263_v2  ;;  %4842 = vmatprep.mubr.msk.f32.mxu1 %vm5264_vm1, %v5263_v2 }
 0x222   :  { %4841 = vmatpush3.msra.mxu1 %v5427_v16  ;;  %4851 = vmatprep.subr.mxu0 %v5263_v2 }
 0x223   :  { %4843 = vmatmul.mubr.msk.f32.vlgmr.msra.gmra.mxu1 %vm75_vm0, %v4377_v38  ;;  %4852 = vmatpush3.msra.mxu0 %v5434_v17 }
 0x224   :  { %4853 = vmatprep.mubr.msk.f32.mxu0 %vm5264_vm1, %v5263_v2  ;;  %4856 = vmatprep.subr.mxu1 %v5263_v2 }
 0x225   :  { %4854 = vmatmul.mubr.msk.f32.vlgmr.msra.gmra.mxu0 %vm75_vm0, %v4377_v38  ;;  %4857 = vmatpush3.msra.mxu1 %v5447_v18 }
 0x226   :  { %4861 = vmatprep.subr.mxu0 %v5263_v2  ;;  %4858 = vmatprep.mubr.msk.f32.mxu1 %vm5264_vm1, %v5263_v2 }
 0x227   :  { %4862 = vmatpush3.msra.mxu0 %v5454_v19  ;;  %4863 = vmatprep.mubr.msk.f32.mxu0 %vm5264_vm1, %v5263_v2 }
 0x228   :  { %4866 = vmatprep.subr.mxu1 %v5263_v2  ;;  %4871 = vmatprep.subr.mxu0 %v5263_v2 }
 0x2cf   :  { %v1513_v41 = vpop.f32.mrf.mxu0  ;;  %v1583_v42 = vpop.f32.mrf.mxu1 }
 0x2d0   :  { %v1514_v44 = vadd.f32 %v5556_v34, %v1513_v41  ;;  %v1584_v50 = vadd.f32 %v5563_v39, %v1583_v42  ;;  %v4387_v41 = vld [vmem:[%s6220_s0 + $0x8] sm:$0x3] }
 0x2d1   :  { %v4801_v45 = vpop.f32.mrf.mxu0  ;;  %v4806_v46 = vpop.f32.mrf.mxu1 }
 0x2d2   :  { %v1657_v47 = vadd.f32 %v1514_v44, %v1301_v40  ;;  %v1664_v53 = vadd.f32 %v1584_v50, %v1371_v52 }
 0x2d3   :  { %v1653_v48 = vpop.f32.mrf.mxu0 }
 0x2d4   :  { %v4375_v49 = vmul.f32 -1.442695, %v1657_v47  ;;  %v4376_v55 = vmul.f32 -1.442695, %v1664_v53  ;;  %v1654_v61 = vadd.f32 %v5575_v54, %v1653_v48 }
 0x2d5   :  { %v4811_v51 = vpop.f32.mrf.mxu0 }
 0x2d6   :  { %5133 = vpow2.f32 %v4375_v49 }
 0x2d7   :  { %5135 = vpow2.f32 %v4376_v55 }
 0x2db   :  { %v1823_v31 = vpop.f32.mrf.mxu0 }
 0x2dc   :  { %v1824_v42 = vadd.f32 %v5551_v29, %v1823_v31 }
 0x2dd   :  { %v4833_v35 = vpop.f32.mrf.mxu0 }
 0x2de   :  { %v4397_v35 = vld [vmem:[%s6220_s0 + $0xa] sm:$0x3] }
 0x2e3   :  { %v5134_v56 = vpop.eup %5133 }
 0x2e4   :  { %v1661_v58 = vadd.f32 1.0, %v5134_v56  ;;  %v5136_v59 = vpop.eup %5135 }
 0x2e5   :  { %v1668_v60 = vadd.f32 1.0, %v5136_v59  ;;  %v1963_v37 = vpop.f32.mrf.mxu0 }
 0x2e6   :  { %5137 = vrcp.f32 %v1661_v58 }
 0x2e7   :  { %5139 = vrcp.f32 %v1668_v60  ;;  %v4855_v40 = vpop.f32.mrf.mxu0 }
 0x2f3   :  { %v5138_v62 = vpop.eup %5137 }
 0x2f4   :  { %v1671_v9 = vmul.f32 %v5138_v62, %v1654_v61  ;;  %v5140_v24 = vpop.eup %5139 }
 0x2f5   :  { %v1674_v20 = vsub.f32 1.0, %v5140_v24  ;;  %v1676_v28 = vmul.f32 %v5140_v24, %v5663_v27  ;;  %v1751_v27 = vpop.f32.mrf.mxu1 }
 0x2f6   :  { %v1672_v22 = vadd.f32 %v1671_v9, %v1441_v63  ;;  %v1752_v32 = vadd.f32 %v5544_v23, %v1751_v27 }
 0x2f7   :  { %v4822_v33 = vpop.f32.mrf.mxu1 }
 0x2f8   :  { %5141 = vtanh.f32 %v1672_v22  ;;  %1756 = vst.msk [vmem:[#allocation2 + $0x6] sm:$0x3] %vm149_vm3, %v1752_v32  ;;  %v1964_v22 = vadd.f32 %v5581_v57, %v1963_v37 }
 0x2f9   :  { %v1893_v36 = vpop.f32.mrf.mxu1 }
 0x2fa   :  { %v1894_v55 = vadd.f32 %v5568_v43, %v1893_v36 }
 0x2fb   :  { %v4844_v38 = vpop.f32.mrf.mxu1 }
 0x305   :  { %v5142_v26 = vpop.eup %5141 }
 0x306   :  { %v1675_v25 = vmul.f32 %v5142_v26, %v1674_v20 }
 0x308   :  { %v5741_v30 = vadd.f32 %v1676_v28, %v1675_v25 }
 0x30a   :  { %1679 = vst.msk [vmem:[#allocation4 + $0x4] sm:$0x3] %vm632_vm4, %v5741_v30  ;;  %4859 = vmatmul.mubr.msk.f32.vlgmr.msra.gmra.mxu1 %vm385_vm2, %v5741_v30  ;;  %4864 = vmatmul.mubr.msk.f32.vlgmr.msra.gmra.mxu0 %vm385_vm2, %v5741_v30 }
 0x30b   :  { %4867 = vmatpush3.msra.mxu1 %v5472_v21  ;;  %4868 = vmatprep.mubr.msk.f32.mxu1 %vm5264_vm1, %v5263_v2 }
 0x30c   :  { %4872 = vmatpush3.msra.mxu0 %v5322_v0  ;;  %4882 = vmatprep.subr.mxu1 %v5263_v2 }
 0x30d   :  { %4873 = vmatprep.subr.mxu0 %v5263_v2  ;;  %4879 = vmatprep.mubr.msk.f32.mxu0 %vm5264_vm1, %v5263_v2 }
 0x30e   :  { %4869 = vmatmul.mubr.msk.f32.vlgmr.msra.gmra.mxu1 %vm385_vm2, %v5741_v30  ;;  %4874 = vmatpush3.msra.mxu0 %v5334_v3 }
 0x30f   :  { %4883 = vmatpush3.msra.mxu1 %v5327_v1  ;;  %4875 = vmatprep.subr.mxu0 %v5263_v2 }
 0x310   :  { %4884 = vmatprep.subr.mxu1 %v5263_v2  ;;  %4876 = vmatpush3.msra.mxu0 %v5348_v5 }
 0x311   :  { %4885 = vmatpush3.msra.mxu1 %v5339_v4  ;;  %4877 = vmatprep.subr.mxu0 %v5263_v2 }
 0x312   :  { %4886 = vmatprep.subr.mxu1 %v5263_v2  ;;  %4878 = vmatpush3.msra.mxu0 %v5362_v7 }
 0x313   :  { %4887 = vmatpush3.msra.mxu1 %v5353_v6  ;;  %4893 = vmatprep.subr.mxu0 %v5263_v2 }
 0x314   :  { %4888 = vmatprep.subr.mxu1 %v5263_v2  ;;  %4890 = vmatprep.mubr.msk.f32.mxu1 %vm5264_vm1, %v5263_v2 }
 0x315   :  { %4889 = vmatpush3.msra.mxu1 %v5369_v8  ;;  %4880 = vmatmul.mubr.msk.f32.vlgmr.msra.gmra.mxu0 %vm75_vm0, %v4387_v41 }
 0x316   :  { %4904 = vmatprep.subr.mxu1 %v5263_v2  ;;  %4891 = vmatmul.mubr.msk.f32.vlgmr.msra.gmra.mxu1 %vm75_vm0, %v4387_v41 }
 0x317   :  { %4894 = vmatpush3.msra.mxu0 %v5384_v10  ;;  %4905 = vmatpush3.msra.mxu1 %v5389_v11 }
 0x318   :  { %4895 = vmatprep.subr.mxu0 %v5263_v2  ;;  %4906 = vmatprep.subr.mxu1 %v5263_v2 }
 0x319   :  { %4896 = vmatpush3.msra.mxu0 %v5399_v12  ;;  %4907 = vmatpush3.msra.mxu1 %v5404_v13 }
 0x31a   :  { %4897 = vmatprep.subr.mxu0 %v5263_v2  ;;  %4908 = vmatprep.subr.mxu1 %v5263_v2 }
 0x31b   :  { %4898 = vmatpush3.msra.mxu0 %v5413_v14  ;;  %4909 = vmatpush3.msra.mxu1 %v5418_v15 }
 0x31c   :  { %4899 = vmatprep.subr.mxu0 %v5263_v2  ;;  %4901 = vmatprep.mubr.msk.f32.mxu0 %vm5264_vm1, %v5263_v2 }
 0x31d   :  { %4900 = vmatpush3.msra.mxu0 %v5427_v16  ;;  %4910 = vmatprep.subr.mxu1 %v5263_v2 }
 0x31e   :  { %4902 = vmatmul.mubr.msk.f32.vlgmr.msra.gmra.mxu0 %vm75_vm0, %v4387_v41  ;;  %4911 = vmatpush3.msra.mxu1 %v5434_v17 }
 0x31f   :  { %4912 = vmatprep.mubr.msk.f32.mxu1 %vm5264_vm1, %v5263_v2  ;;  %4915 = vmatprep.subr.mxu0 %v5263_v2 }
 0x320   :  { %4913 = vmatmul.mubr.msk.f32.vlgmr.msra.gmra.mxu1 %vm75_vm0, %v4387_v41  ;;  %4916 = vmatpush3.msra.mxu0 %v5447_v18 }
 0x321   :  { %4920 = vmatprep.subr.mxu1 %v5263_v2  ;;  %4917 = vmatprep.mubr.msk.f32.mxu0 %vm5264_vm1, %v5263_v2 }
 0x322   :  { %4921 = vmatpush3.msra.mxu1 %v5454_v19  ;;  %4922 = vmatprep.mubr.msk.f32.mxu1 %vm5264_vm1, %v5263_v2 }
 0x323   :  { %4925 = vmatprep.subr.mxu0 %v5263_v2  ;;  %4930 = vmatprep.subr.mxu1 %v5263_v2 }
 0x3ca   :  { %v2036_v44 = vpop.f32.mrf.mxu1  ;;  %v2106_v45 = vpop.f32.mrf.mxu0 }
 0x3cb   :  { %v2037_v46 = vadd.f32 %v5556_v34, %v2036_v44  ;;  %v2107_v52 = vadd.f32 %v5563_v39, %v2106_v45 }
 0x3cc   :  { %v4860_v47 = vpop.f32.mrf.mxu1  ;;  %v4865_v48 = vpop.f32.mrf.mxu0 }
 0x3cd   :  { %v2180_v49 = vadd.f32 %v2037_v46, %v1824_v42  ;;  %v2187_v56 = vadd.f32 %v2107_v52, %v1894_v55 }
 0x3ce   :  { %v2176_v50 = vpop.f32.mrf.mxu1 }
 0x3cf   :  { %v4385_v51 = vmul.f32 -1.442695, %v2180_v49  ;;  %v4386_v58 = vmul.f32 -1.442695, %v2187_v56  ;;  %v2177_v63 = vadd.f32 %v5575_v54, %v2176_v50 }
 0x3d0   :  { %v4870_v53 = vpop.f32.mrf.mxu1 }
 0x3d1   :  { %5143 = vpow2.f32 %v4385_v51 }
 0x3d2   :  { %5145 = vpow2.f32 %v4386_v58  ;;  %v5911_v58 = vld [vmem:[%s6222_s2 + $0x18] sm:$0xff] }
 0x3de   :  { %v5144_v59 = vpop.eup %5143 }
 0x3df   :  { %v2184_v60 = vadd.f32 1.0, %v5144_v59  ;;  %v5146_v61 = vpop.eup %5145  ;;  %v5929_v59 = vld [vmem:[%s6224_s4 + $0x18] sm:$0xff] }
 0x3e0   :  { %v2191_v62 = vadd.f32 1.0, %v5146_v61  ;;  %v5943_v61 = vld [vmem:[%s6224_s4 + $0x10] sm:$0xff] }
 0x3e1   :  { %5147 = vrcp.f32 %v2184_v60  ;;  %v5937_v60 = vld [vmem:[%s6222_s2 + $0x8] sm:$0xff] }
 0x3e2   :  { %5149 = vrcp.f32 %v2191_v62  ;;  %v5951_v62 = vld [vmem:[%s6222_s2] sm:$0xff] }
 0x3ee   :  { %v5148_v9 = vpop.eup %5147 }
 0x3ef   :  { %v2194_v24 = vmul.f32 %v5148_v9, %v2177_v63  ;;  %v5150_v26 = vpop.eup %5149  ;;  %v5957_v63 = vld [vmem:[%s6224_s4 + $0x8] sm:$0xff]  ;;  %v5967_v9 = vld [vmem:[%s6224_s4] sm:$0xff] }
 0x3f0   :  { %v2197_v25 = vsub.f32 1.0, %v5150_v26  ;;  %v2199_v31 = vmul.f32 %v5150_v26, %v5741_v30 }
 0x3f1   :  { %v2195_v20 = vadd.f32 %v2194_v24, %v1964_v22 }
 0x3f3   :  { %5151 = vtanh.f32 %v2195_v20 }
 0x400   :  { %v5152_v28 = vpop.eup %5151 }
 0x401   :  { %v2198_v27 = vmul.f32 %v5152_v28, %v2197_v25 }
 0x403   :  { %v5819_v32 = vadd.f32 %v2199_v31, %v2198_v27 }
 0x405   :  { %2202 = vst.msk [vmem:[#allocation4 + $0x6] sm:$0x3] %vm632_vm4, %v5819_v32  ;;  %4918 = vmatmul.mubr.msk.f32.vlgmr.msra.gmra.mxu0 %vm385_vm2, %v5819_v32  ;;  %4923 = vmatmul.mubr.msk.f32.vlgmr.msra.gmra.mxu1 %vm385_vm2, %v5819_v32 }
 0x406   :  { %4926 = vmatpush3.msra.mxu0 %v5472_v21  ;;  %4927 = vmatprep.mubr.msk.f32.mxu0 %vm5264_vm1, %v5263_v2 }
 0x407   :  { %4931 = vmatpush3.msra.mxu1 %v5322_v0  ;;  %4941 = vmatprep.subr.mxu0 %v5263_v2  ;;  %v2274_v0 = vpop.f32.mrf.mxu0 }
 0x408   :  { %4932 = vmatprep.subr.mxu1 %v5263_v2  ;;  %4938 = vmatprep.mubr.msk.f32.mxu1 %vm5264_vm1, %v5263_v2 }
 0x409   :  { %4928 = vmatmul.mubr.msk.f32.vlgmr.msra.gmra.mxu0 %vm385_vm2, %v5819_v32  ;;  %4933 = vmatpush3.msra.mxu1 %v5334_v3  ;;  %v2275_v3 = vadd.f32 %v5544_v23, %v2274_v0  ;;  %v4407_v0 = vld [vmem:[%s6220_s0 + $0xc] sm:$0x3] }
 0x40a   :  { %4942 = vmatpush3.msra.mxu0 %v5327_v1  ;;  %4934 = vmatprep.subr.mxu1 %v5263_v2  ;;  %v2346_v1 = vpop.f32.mrf.mxu1 }
 0x40b   :  { %4943 = vmatprep.subr.mxu0 %v5263_v2  ;;  %4935 = vmatpush3.msra.mxu1 %v5348_v5  ;;  %2279 = vst.msk [vmem:[#allocation2 + $0x8] sm:$0x3] %vm149_vm3, %v2275_v3  ;;  %v5997_v3 = vld [vmem:[%s6224_s4 + $0x30] sm:$0xff] }
 0x40c   :  { %4944 = vmatpush3.msra.mxu0 %v5339_v4  ;;  %4936 = vmatprep.subr.mxu1 %v5263_v2  ;;  %v4881_v4 = vpop.f32.mrf.mxu0  ;;  %v4892_v5 = vpop.f32.mrf.mxu1 }
 0x40d   :  { %4945 = vmatprep.subr.mxu0 %v5263_v2  ;;  %4937 = vmatpush3.msra.mxu1 %v5362_v7  ;;  %v6003_v4 = vld [vmem:[%s6224_s4 + $0x50] sm:$0xff]  ;;  %v6011_v5 = vld [vmem:[%s6224_s4 + $0x28] sm:$0xff] }
 0x40e   :  { %4946 = vmatpush3.msra.mxu0 %v5353_v6  ;;  %4952 = vmatprep.subr.mxu1 %v5263_v2  ;;  %v2416_v6 = vpop.f32.mrf.mxu0  ;;  %v2486_v7 = vpop.f32.mrf.mxu1 }
 0x40f   :  { %4947 = vmatprep.subr.mxu0 %v5263_v2  ;;  %4949 = vmatprep.mubr.msk.f32.mxu0 %vm5264_vm1, %v5263_v2  ;;  %v2417_v36 = vadd.f32 %v5568_v43, %v2416_v6  ;;  %v2487_v47 = vadd.f32 %v5581_v57, %v2486_v7  ;;  %v6017_v6 = vld [vmem:[%s6224_s4 + $0x48] sm:$0xff]  ;;  %v6026_v7 = vld [vmem:[%s6224_s4 + $0x20] sm:$0xff] }
 0x410   :  { %4948 = vmatpush3.msra.mxu0 %v5369_v8  ;;  %v4903_v30 = vpop.f32.mrf.mxu0  ;;  %v4914_v33 = vpop.f32.mrf.mxu1  ;;  %4939 = vmatmul.mubr.msk.f32.vlgmr.msra.gmra.mxu1 %vm75_vm0, %v4397_v35  ;;  %v2347_v8 = vadd.f32 %v5551_v29, %v2346_v1  ;;  %v5989_v1 = vld [vmem:[%s6224_s4 + $0x58] sm:$0xff] }
 0x411   :  { %4963 = vmatprep.subr.mxu0 %v5263_v2  ;;  %4950 = vmatmul.mubr.msk.f32.vlgmr.msra.gmra.mxu0 %vm75_vm0, %v4397_v35  ;;  %v6034_v30 = vld [vmem:[%s6224_s4 + $0x40] sm:$0xff] }
 0x412   :  { %4953 = vmatpush3.msra.mxu1 %v5384_v10  ;;  %4964 = vmatpush3.msra.mxu0 %v5389_v11  ;;  %v6044_v33 = vld [vmem:[%s6225_s5] sm:$0xff] }
 0x413   :  { %4954 = vmatprep.subr.mxu1 %v5263_v2  ;;  %4965 = vmatprep.subr.mxu0 %v5263_v2 }
 0x414   :  { %4955 = vmatpush3.msra.mxu1 %v5399_v12  ;;  %4966 = vmatpush3.msra.mxu0 %v5404_v13 }
 0x415   :  { %4956 = vmatprep.subr.mxu1 %v5263_v2  ;;  %4967 = vmatprep.subr.mxu0 %v5263_v2 }
 0x416   :  { %4957 = vmatpush3.msra.mxu1 %v5413_v14  ;;  %4968 = vmatpush3.msra.mxu0 %v5418_v15 }
 0x417   :  { %4958 = vmatprep.subr.mxu1 %v5263_v2  ;;  %4960 = vmatprep.mubr.msk.f32.mxu1 %vm5264_vm1, %v5263_v2 }
 0x418   :  { %4959 = vmatpush3.msra.mxu1 %v5427_v16  ;;  %4969 = vmatprep.subr.mxu0 %v5263_v2 }
 0x419   :  { %4961 = vmatmul.mubr.msk.f32.vlgmr.msra.gmra.mxu1 %vm75_vm0, %v4397_v35  ;;  %4970 = vmatpush3.msra.mxu0 %v5434_v17 }
 0x41a   :  { %4971 = vmatprep.mubr.msk.f32.mxu0 %vm5264_vm1, %v5263_v2  ;;  %4974 = vmatprep.subr.mxu1 %v5263_v2 }
 0x41b   :  { %4972 = vmatmul.mubr.msk.f32.vlgmr.msra.gmra.mxu0 %vm75_vm0, %v4397_v35  ;;  %4975 = vmatpush3.msra.mxu1 %v5447_v18  ;;  %v6053_v35 = vld [vmem:[%s6225_s5 + $0x8] sm:$0xff] }
 0x41c   :  { %4979 = vmatprep.subr.mxu0 %v5263_v2  ;;  %4976 = vmatprep.mubr.msk.f32.mxu1 %vm5264_vm1, %v5263_v2 }
 0x41d   :  { %4980 = vmatpush3.msra.mxu0 %v5454_v19  ;;  %4981 = vmatprep.mubr.msk.f32.mxu0 %vm5264_vm1, %v5263_v2 }
 0x41e   :  { %4984 = vmatprep.subr.mxu1 %v5263_v2  ;;  %4989 = vmatprep.subr.mxu0 %v5263_v2 }
 0x4c5   :  { %v2559_v10 = vpop.f32.mrf.mxu0  ;;  %v2629_v11 = vpop.f32.mrf.mxu1 }
 0x4c6   :  { %v2560_v12 = vadd.f32 %v5556_v34, %v2559_v10  ;;  %v2630_v18 = vadd.f32 %v5563_v39, %v2629_v11 }
 0x4c7   :  { %v4919_v13 = vpop.f32.mrf.mxu0  ;;  %v4924_v14 = vpop.f32.mrf.mxu1 }
 0x4c8   :  { %v2703_v15 = vadd.f32 %v2560_v12, %v2347_v8  ;;  %v2710_v37 = vadd.f32 %v2630_v18, %v2417_v36 }
 0x4c9   :  { %v2699_v16 = vpop.f32.mrf.mxu0 }
 0x4ca   :  { %v4395_v17 = vmul.f32 -1.442695, %v2703_v15  ;;  %v4396_v38 = vmul.f32 -1.442695, %v2710_v37  ;;  %v2700_v45 = vadd.f32 %v5575_v54, %v2699_v16 }
 0x4cb   :  { %v4929_v19 = vpop.f32.mrf.mxu0 }
 0x4cc   :  { %5153 = vpow2.f32 %v4395_v17 }
 0x4cd   :  { %5155 = vpow2.f32 %v4396_v38 }
 0x4d0   :  { %v2797_v22 = vpop.f32.mrf.mxu1 }
 0x4d1   :  { %v2869_v24 = vpop.f32.mrf.mxu0  ;;  %v2798_v20 = vadd.f32 %v5544_v23, %v2797_v22  ;;  %v5983_v23 = vld [vmem:[%s6224_s4 + $0x38] sm:$0xff] }
 0x4d2   :  { %v4940_v26 = vpop.f32.mrf.mxu1  ;;  %v2870_v8 = vadd.f32 %v5551_v29, %v2869_v24 }
 0x4d3   :  { %v4951_v25 = vpop.f32.mrf.mxu0  ;;  %2802 = vst.msk [vmem:[#allocation2 + $0xa] sm:$0x3] %vm149_vm3, %v2798_v20  ;;  %v6157_v20 = vld [vmem:[%s6227_s7] ss:$0 sm:$0xff] }
 0x4d9   :  { %v5154_v40 = vpop.eup %5153  ;;  %v2939_v28 = vpop.f32.mrf.mxu1 }
 0x4da   :  { %v2707_v41 = vadd.f32 1.0, %v5154_v40  ;;  %v5156_v42 = vpop.eup %5155  ;;  %v2940_v36 = vadd.f32 %v5568_v43, %v2939_v28 }
 0x4db   :  { %v2714_v44 = vadd.f32 1.0, %v5156_v42  ;;  %v5973_v27 = vpop.f32.mrf.mxu0  ;;  %v4962_v31 = vpop.f32.mrf.mxu1 }
 0x4dc   :  { %5157 = vrcp.f32 %v2707_v41 }
 0x4dd   :  { %5159 = vrcp.f32 %v2714_v44 }
 0x4e9   :  { %v5158_v46 = vpop.eup %5157 }
 0x4ea   :  { %v2717_v48 = vmul.f32 %v5158_v46, %v2700_v45  ;;  %v5160_v50 = vpop.eup %5159  ;;  %v3010_v45 = vadd.f32 %v5581_v57, %v5973_v27 }
 0x4eb   :  { %v2720_v51 = vsub.f32 1.0, %v5160_v50  ;;  %v2722_v55 = vmul.f32 %v5160_v50, %v5819_v32  ;;  %v4973_v32 = vpop.f32.mrf.mxu0 }
 0x4ec   :  { %v2718_v49 = vadd.f32 %v2717_v48, %v2487_v47 }
 0x4ee   :  { %5161 = vtanh.f32 %v2718_v49 }
 0x4fb   :  { %v5162_v52 = vpop.eup %5161 }
 0x4fc   :  { %v2721_v53 = vmul.f32 %v5162_v52, %v2720_v51 }
 0x4fe   :  { %v5897_v56 = vadd.f32 %v2722_v55, %v2721_v53  ;;  %v6110_v53 = vld [vmem:[%s6223_s3] ss:$0 sm:$0xff] }
 0x500   :  { %2725 = vst.msk [vmem:[#allocation4 + $0x8] sm:$0x3] %vm632_vm4, %v5897_v56  ;;  %4977 = vmatmul.mubr.msk.f32.vlgmr.msra.gmra.mxu1 %vm385_vm2, %v5897_v56  ;;  %4982 = vmatmul.mubr.msk.f32.vlgmr.msra.gmra.mxu0 %vm385_vm2, %v5897_v56 }
 0x501   :  { %4985 = vmatpush3.msra.mxu1 %v5472_v21  ;;  %4986 = vmatprep.mubr.msk.f32.mxu1 %vm5264_vm1, %v5263_v2  ;;  %v5923_v21 = vld [vmem:[%s6222_s2 + $0x10] sm:$0xff] }
 0x502   :  { %4990 = vmatpush3.msra.mxu0 %v5911_v58  ;;  %5000 = vmatprep.subr.mxu1 %v5263_v2 }
 0x503   :  { %4991 = vmatprep.subr.mxu0 %v5263_v2  ;;  %4997 = vmatprep.mubr.msk.f32.mxu0 %vm5264_vm1, %v5263_v2 }
 0x504   :  { %4987 = vmatmul.mubr.msk.f32.vlgmr.msra.gmra.mxu1 %vm385_vm2, %v5897_v56  ;;  %4992 = vmatpush3.msra.mxu0 %v5923_v21 }
 0x505   :  { %5001 = vmatpush3.msra.mxu1 %v5929_v59  ;;  %4993 = vmatprep.subr.mxu0 %v5263_v2 }
 0x506   :  { %5002 = vmatprep.subr.mxu1 %v5263_v2  ;;  %4994 = vmatpush3.msra.mxu0 %v5937_v60 }
 0x507   :  { %5003 = vmatpush3.msra.mxu1 %v5943_v61  ;;  %4995 = vmatprep.subr.mxu0 %v5263_v2 }
 0x508   :  { %5004 = vmatprep.subr.mxu1 %v5263_v2  ;;  %4996 = vmatpush3.msra.mxu0 %v5951_v62 }
 0x509   :  { %5005 = vmatpush3.msra.mxu1 %v5957_v63  ;;  %5011 = vmatprep.subr.mxu0 %v5263_v2 }
 0x50a   :  { %5006 = vmatprep.subr.mxu1 %v5263_v2  ;;  %5008 = vmatprep.mubr.msk.f32.mxu1 %vm5264_vm1, %v5263_v2 }
 0x50b   :  { %5007 = vmatpush3.msra.mxu1 %v5967_v9  ;;  %4998 = vmatmul.mubr.msk.f32.vlgmr.msra.gmra.mxu0 %vm75_vm0, %v4407_v0 }
 0x50c   :  { %5022 = vmatprep.subr.mxu1 %v5263_v2  ;;  %5009 = vmatmul.mubr.msk.f32.vlgmr.msra.gmra.mxu1 %vm75_vm0, %v4407_v0 }
 0x50d   :  { %5012 = vmatpush3.msra.mxu0 %v5983_v23  ;;  %5023 = vmatpush3.msra.mxu1 %v5989_v1 }
 0x50e   :  { %5013 = vmatprep.subr.mxu0 %v5263_v2  ;;  %5024 = vmatprep.subr.mxu1 %v5263_v2 }
 0x50f   :  { %5014 = vmatpush3.msra.mxu0 %v5997_v3  ;;  %5025 = vmatpush3.msra.mxu1 %v6003_v4 }
 0x510   :  { %5015 = vmatprep.subr.mxu0 %v5263_v2  ;;  %5026 = vmatprep.subr.mxu1 %v5263_v2 }
 0x511   :  { %5016 = vmatpush3.msra.mxu0 %v6011_v5  ;;  %5027 = vmatpush3.msra.mxu1 %v6017_v6 }
 0x512   :  { %5017 = vmatprep.subr.mxu0 %v5263_v2  ;;  %5019 = vmatprep.mubr.msk.f32.mxu0 %vm5264_vm1, %v5263_v2 }
 0x513   :  { %5018 = vmatpush3.msra.mxu0 %v6026_v7  ;;  %5028 = vmatprep.subr.mxu1 %v5263_v2 }
 0x514   :  { %5020 = vmatmul.mubr.msk.f32.vlgmr.msra.gmra.mxu0 %vm75_vm0, %v4407_v0  ;;  %5029 = vmatpush3.msra.mxu1 %v6034_v30 }
 0x515   :  { %5030 = vmatprep.mubr.msk.f32.mxu1 %vm5264_vm1, %v5263_v2  ;;  %5033 = vmatprep.subr.mxu0 %v5263_v2 }
 0x516   :  { %5031 = vmatmul.mubr.msk.f32.vlgmr.msra.gmra.mxu1 %vm75_vm0, %v4407_v0  ;;  %5034 = vmatpush3.msra.mxu0 %v6044_v33  ;;  %v6163_v0 = vld [vmem:[%s6227_s7 + $0x1] ss:$0 sm:$0xff] }
 0x517   :  { %5038 = vmatprep.subr.mxu1 %v5263_v2  ;;  %5035 = vmatprep.mubr.msk.f32.mxu0 %vm5264_vm1, %v5263_v2 }
 0x518   :  { %5039 = vmatpush3.msra.mxu1 %v6053_v35  ;;  %5040 = vmatprep.mubr.msk.f32.mxu1 %vm5264_vm1, %v5263_v2 }
 0x519   :  { %5043 = vmatprep.subr.mxu0 %v5263_v2  ;;  %5048 = vmatprep.subr.mxu1 %v5263_v2 }
 0x5c0   :  { %v3082_v10 = vpop.f32.mrf.mxu1  ;;  %v3152_v11 = vpop.f32.mrf.mxu0 }
 0x5c1   :  { %v3083_v12 = vadd.f32 %v5556_v34, %v3082_v10  ;;  %v3153_v18 = vadd.f32 %v5563_v39, %v3152_v11 }
 0x5c2   :  { %v4978_v13 = vpop.f32.mrf.mxu1  ;;  %v4983_v14 = vpop.f32.mrf.mxu0 }
 0x5c3   :  { %v3226_v15 = vadd.f32 %v3083_v12, %v2870_v8  ;;  %v3233_v37 = vadd.f32 %v3153_v18, %v2940_v36  ;;  %v6175_v8 = vld [vmem:[%s6227_s7 + $0x2] ss:$0 sm:$0xff] }
 0x5c4   :  { %v3222_v16 = vpop.f32.mrf.mxu1  ;;  %v6181_v12 = vld [vmem:[%s6226_s6 + $0x2] ss:$0 sm:$0xff] }
 0x5c5   :  { %v4405_v17 = vmul.f32 -1.442695, %v3226_v15  ;;  %v4406_v38 = vmul.f32 -1.442695, %v3233_v37  ;;  %v3223_v34 = vadd.f32 %v5575_v54, %v3222_v16  ;;  %v6079_v54 = vld [vmem:[%s6225_s5 + $0x10] sm:$0xff] }
 0x5c6   :  { %v4988_v19 = vpop.f32.mrf.mxu1 }
 0x5c7   :  { %5163 = vpow2.f32 %v4405_v17 }
 0x5c8   :  { %5165 = vpow2.f32 %v4406_v38 }
 0x5cb   :  { %v3320_v57 = vpop.f32.mrf.mxu0 }
 0x5cc   :  { %v3392_v52 = vpop.f32.mrf.mxu1  ;;  %v3321_v55 = vadd.f32 %v6110_v53, %v3320_v57 }
 0x5ce   :  { %3325 = vst.msk [vmem:[#allocation2 + $0xc] sm:$0x3] %vm149_vm3, %v3321_v55 }
 0x5d4   :  { %v5164_v40 = vpop.eup %5163 }
 0x5d5   :  { %v3230_v29 = vadd.f32 1.0, %v5164_v40  ;;  %v5166_v41 = vpop.eup %5165 }
 0x5d6   :  { %v3237_v42 = vadd.f32 1.0, %v5166_v41 }
 0x5d7   :  { %5167 = vrcp.f32 %v3230_v29 }
 0x5d8   :  { %5169 = vrcp.f32 %v3237_v42 }
 0x5e4   :  { %v5168_v44 = vpop.eup %5167 }
 0x5e5   :  { %v3240_v39 = vmul.f32 %v5168_v44, %v3223_v34  ;;  %v5170_v43 = vpop.eup %5169 }
 0x5e6   :  { %v3243_v47 = vsub.f32 1.0, %v5170_v43  ;;  %v3245_v50 = vmul.f32 %v5170_v43, %v5897_v56  ;;  %v4999_v56 = vpop.f32.mrf.mxu0 }
 0x5e7   :  { %v3241_v46 = vadd.f32 %v3240_v39, %v3010_v45 }
 0x5e9   :  { %5171 = vtanh.f32 %v3241_v46 }
 0x5f6   :  { %v5172_v48 = vpop.eup %5171 }
 0x5f7   :  { %v3244_v49 = vmul.f32 %v5172_v48, %v3243_v47 }
 0x5f9   :  { %v6068_v51 = vadd.f32 %v3245_v50, %v3244_v49 }
 0x5fb   :  { %3248 = vst.msk [vmem:[#allocation4 + $0xa] sm:$0x3] %vm632_vm4, %v6068_v51  ;;  %5036 = vmatmul.mubr.msk.f32.vlgmr.msra.gmra.mxu0 %vm385_vm2, %v6068_v51  ;;  %5041 = vmatmul.mubr.msk.f32.vlgmr.msra.gmra.mxu1 %vm385_vm2, %v6068_v51 }
 0x5fc   :  { %5044 = vmatpush3.msra.mxu0 %v6079_v54  ;;  %5045 = vmatprep.mubr.msk.f32.mxu0 %vm5264_vm1, %v5263_v2 }
 0x5fd   :  { %5049 = vmatpush3.msra.mxu1 %v5911_v58  ;;  %5059 = vmatprep.subr.mxu0 %v5263_v2  ;;  %v5010_v58 = vpop.f32.mrf.mxu1 }
 0x5fe   :  { %5050 = vmatprep.subr.mxu1 %v5263_v2  ;;  %5056 = vmatprep.mubr.msk.f32.mxu1 %vm5264_vm1, %v5263_v2 }
 0x5ff   :  { %5046 = vmatmul.mubr.msk.f32.vlgmr.msra.gmra.mxu0 %vm385_vm2, %v6068_v51  ;;  %5051 = vmatpush3.msra.mxu1 %v5923_v21  ;;  %v3462_v21 = vpop.f32.mrf.mxu0 }
 0x600   :  { %5060 = vmatpush3.msra.mxu0 %v5929_v59  ;;  %5052 = vmatprep.subr.mxu1 %v5263_v2  ;;  %v3532_v59 = vpop.f32.mrf.mxu1 }
 0x601   :  { %5061 = vmatprep.subr.mxu0 %v5263_v2  ;;  %5053 = vmatpush3.msra.mxu1 %v5937_v60  ;;  %v5021_v60 = vpop.f32.mrf.mxu0  ;;  %v3533_v13 = vadd.f32 %v6181_v12, %v3532_v59 }
 0x602   :  { %5062 = vmatpush3.msra.mxu0 %v5943_v61  ;;  %5054 = vmatprep.subr.mxu1 %v5263_v2  ;;  %v5032_v61 = vpop.f32.mrf.mxu1 }
 0x603   :  { %5063 = vmatprep.subr.mxu0 %v5263_v2  ;;  %5055 = vmatpush3.msra.mxu1 %v5951_v62  ;;  %v4417_v62 = vld [vmem:[%s6220_s0 + $0xe] sm:$0x3] }
 0x604   :  { %5064 = vmatpush3.msra.mxu0 %v5957_v63  ;;  %5070 = vmatprep.subr.mxu1 %v5263_v2  ;;  %v6151_v63 = vld [vmem:[%s6226_s6] ss:$0 sm:$0xff] }
 0x605   :  { %5065 = vmatprep.subr.mxu0 %v5263_v2  ;;  %5067 = vmatprep.mubr.msk.f32.mxu0 %vm5264_vm1, %v5263_v2 }
 0x606   :  { %5066 = vmatpush3.msra.mxu0 %v5967_v9  ;;  %5057 = vmatmul.mubr.msk.f32.vlgmr.msra.gmra.mxu1 %vm75_vm0, %v4417_v62  ;;  %v3393_v9 = vadd.f32 %v6151_v63, %v3392_v52 }
 0x607   :  { %5081 = vmatprep.subr.mxu0 %v5263_v2  ;;  %5068 = vmatmul.mubr.msk.f32.vlgmr.msra.gmra.mxu0 %vm75_vm0, %v4417_v62 }
 0x608   :  { %5071 = vmatpush3.msra.mxu1 %v5983_v23  ;;  %5082 = vmatpush3.msra.mxu0 %v5989_v1 }
 0x609   :  { %5072 = vmatprep.subr.mxu1 %v5263_v2  ;;  %5083 = vmatprep.subr.mxu0 %v5263_v2 }
 0x60a   :  { %5073 = vmatpush3.msra.mxu1 %v5997_v3  ;;  %5084 = vmatpush3.msra.mxu0 %v6003_v4  ;;  %v6169_v3 = vld [vmem:[%s6226_s6 + $0x1] ss:$0 sm:$0xff]  ;;  %s5265_s6 = smov [#allocation2]  }
 0x60b   :  { %5074 = vmatprep.subr.mxu1 %v5263_v2  ;;  %5085 = vmatprep.subr.mxu0 %v5263_v2  ;;  %v3463_v4 = vadd.f32 %v6169_v3, %v3462_v21  ;;  %s4300_s7 = sshll.u32 %s5265_s6, 4  ;;  %s4301_s7 = int_to_ptr.vmem [resolvable:$true] %s4300_s7 }
 0x60c   :  { %5075 = vmatpush3.msra.mxu1 %v6011_v5  ;;  %5086 = vmatpush3.msra.mxu0 %v6017_v6  ;;  %s5219_s16 = scalar_lea.vmem %s4301_s7, 256  ;;  %p5224_p1 = scmp.lt.s32.totalorder %s4301_s7, %s4301_s7 }
 0x60d   :  { %5076 = vmatprep.subr.mxu1 %v5263_v2  ;;  %5078 = vmatprep.mubr.msk.f32.mxu1 %vm5264_vm1, %v5263_v2  ;;  %p5220_p0 = scmp.ne.s32.totalorder %s4301_s7, %s5219_s16  ;;  %p5225_p2 = scmp.lt.s32.totalorder %s5219_s16, %s5219_s16 }
 0x60e   :  { %5077 = vmatpush3.msra.mxu1 %v6026_v7  ;;  %5087 = vmatprep.subr.mxu0 %v5263_v2 }
 0x60f   :  { %5079 = vmatmul.mubr.msk.f32.vlgmr.msra.gmra.mxu1 %vm75_vm0, %v4417_v62  ;;  %5088 = vmatpush3.msra.mxu0 %v6034_v30  ;;  %p5226_p3 = por %p5225_p2, %p5224_p1 }
 0x610   :  { %5089 = vmatprep.mubr.msk.f32.mxu0 %vm5264_vm1, %v5263_v2  ;;  %5092 = vmatprep.subr.mxu1 %v5263_v2 }
 0x611   :  { %5090 = vmatmul.mubr.msk.f32.vlgmr.msra.gmra.mxu0 %vm75_vm0, %v4417_v62  ;;  %5093 = vmatpush3.msra.mxu1 %v6044_v33  ;;  %p5227_p4 = pnand %p5226_p3, %p5220_p0 }
 0x612   :  { %5097 = vmatprep.subr.mxu0 %v5263_v2  ;;  %5094 = vmatprep.mubr.msk.f32.mxu1 %vm5264_vm1, %v5263_v2 }
 0x613   :  { %5098 = vmatpush3.msra.mxu0 %v6053_v35  ;;  %5099 = vmatprep.mubr.msk.f32.mxu0 %vm5264_vm1, %v5263_v2 }
 0x614   :  { %5102 = vmatprep.subr.mxu1 %v5263_v2 }
 0x6bb   :  { %v3605_v22 = vpop.f32.mrf.mxu0  ;;  %v3675_v24 = vpop.f32.mrf.mxu1 }
 0x6bc   :  { %v3606_v26 = vadd.f32 %v6157_v20, %v3605_v22  ;;  %v3676_v23 = vadd.f32 %v6163_v0, %v3675_v24 }
 0x6bd   :  { %v5037_v25 = vpop.f32.mrf.mxu0  ;;  %v5042_v28 = vpop.f32.mrf.mxu1 }
 0x6be   :  { %v3749_v27 = vadd.f32 %v3606_v26, %v3393_v9  ;;  %v3756_v5 = vadd.f32 %v3676_v23, %v3463_v4 }
 0x6bf   :  { %v3745_v31 = vpop.f32.mrf.mxu0 }
 0x6c0   :  { %v4415_v32 = vmul.f32 -1.442695, %v3749_v27  ;;  %v4416_v6 = vmul.f32 -1.442695, %v3756_v5  ;;  %v3746_v10 = vadd.f32 %v6175_v8, %v3745_v31 }
 0x6c1   :  { %v5047_v1 = vpop.f32.mrf.mxu0 }
 0x6c2   :  { %5173 = vpow2.f32 %v4415_v32 }
 0x6c3   :  { %5175 = vpow2.f32 %v4416_v6 }
 0x6c6   :  { %v3843_v38 = vpop.f32.mrf.mxu1 }
 0x6c7   :  { %v3915_v40 = vpop.f32.mrf.mxu0  ;;  %v3844_v29 = vadd.f32 %v6110_v53, %v3843_v38 }
 0x6c8   :  { %v5058_v41 = vpop.f32.mrf.mxu1 }
 0x6c9   :  { %v5069_v42 = vpop.f32.mrf.mxu0  ;;  %3848 = vst.msk [vmem:[#allocation2 + $0xe] sm:$0x3] %vm149_vm3, %v3844_v29 }
 0x6cf   :  { %v5174_v7 = vpop.eup %5173  ;;  %v3985_v34 = vpop.f32.mrf.mxu1 }
 0x6d0   :  { %v3753_v30 = vadd.f32 1.0, %v5174_v7  ;;  %v5176_v33 = vpop.eup %5175 }
 0x6d1   :  { %v3760_v35 = vadd.f32 1.0, %v5176_v33  ;;  %v4055_v44 = vpop.f32.mrf.mxu0  ;;  %v5080_v45 = vpop.f32.mrf.mxu1 }
 0x6d2   :  { %5177 = vrcp.f32 %v3753_v30 }
 0x6d3   :  { %5179 = vrcp.f32 %v3760_v35  ;;  %v5091_v39 = vpop.f32.mrf.mxu0 }
 0x6df   :  { %v5178_v11 = vpop.eup %5177 }
 0x6e0   :  { %v3763_v14 = vmul.f32 %v5178_v11, %v3746_v10  ;;  %v5180_v16 = vpop.eup %5179 }
 0x6e1   :  { %v3766_v17 = vsub.f32 1.0, %v5180_v16  ;;  %v3768_v36 = vmul.f32 %v5180_v16, %v6068_v51 }
 0x6e2   :  { %v3764_v15 = vadd.f32 %v3763_v14, %v3533_v13 }
 0x6e4   :  { %5181 = vtanh.f32 %v3764_v15 }
 0x6f1   :  { %v5182_v18 = vpop.eup %5181 }
 0x6f2   :  { %v3767_v19 = vmul.f32 %v5182_v18, %v3766_v17 }
 0x6f4   :  { %v6185_v37 = vadd.f32 %v3768_v36, %v3767_v19 }
 0x6f6   :  { %3771 = vst.msk [vmem:[#allocation4 + $0xc] sm:$0x3] %vm632_vm4, %v6185_v37  ;;  %5095 = vmatmul.mubr.msk.f32.vlgmr.msra.gmra.mxu1 %vm385_vm2, %v6185_v37  ;;  %5100 = vmatmul.mubr.msk.f32.vlgmr.msra.gmra.mxu0 %vm385_vm2, %v6185_v37 }
 0x6f7   :  { %5103 = vmatpush3.msra.mxu1 %v6079_v54  ;;  %5104 = vmatprep.mubr.msk.f32.mxu1 %vm5264_vm1, %v5263_v2 }
 0x6fa   :  { %5105 = vmatmul.mubr.msk.f32.vlgmr.msra.gmra.mxu1 %vm385_vm2, %v6185_v37 }
 0x6fb   :  { %5230 = shalt.err (!%p5227_p4)
}
 0x6fc   :  { %s5266_s17 = smov 32   ;;  %s5267_s18 = smov 2   ;;  %v3916_v2 = vadd.f32 %v6151_v63, %v3915_v40  ;;  %v3986_v53 = vadd.f32 %v6169_v3, %v3985_v34  ;;  %v4056_v63 = vadd.f32 %v6181_v12, %v4055_v44 }
 0x6fd   :  { %4306 = dma.vmem_to_hbm [thread:$0]  %s4301_s7, 256, %s6228_s8, [#allocation3], %s5266_s17, %s5266_s17, %s5267_s18  }
 0x6fe   :  { %s5268_s8 = smov [#allocation4]  }
 0x6ff   :  { %s4312_s21 = sshll.u32 %s5268_s8, 4  ;;  %s4313_s21 = int_to_ptr.vmem [resolvable:$true] %s4312_s21 }
 0x700   :  { %s5239_s22 = scalar_lea.vmem %s4313_s21, 256  ;;  %p5244_p6 = scmp.lt.s32.totalorder %s4313_s21, %s4313_s21 }
 0x701   :  { %p5240_p5 = scmp.ne.s32.totalorder %s4313_s21, %s5239_s22  ;;  %p5245_p7 = scmp.lt.s32.totalorder %s5239_s22, %s5239_s22 }
 0x703   :  { %p5246_p8 = por %p5245_p7, %p5244_p6 }
 0x705   :  { %p5247_p9 = pnand %p5246_p8, %p5240_p5 }
 0x7b6   :  { %v4128_v46 = vpop.f32.mrf.mxu1  ;;  %v4198_v43 = vpop.f32.mrf.mxu0 }
 0x7b7   :  { %v4129_v47 = vadd.f32 %v6157_v20, %v4128_v46  ;;  %v4199_v57 = vadd.f32 %v6163_v0, %v4198_v43 }
 0x7b8   :  { %v5096_v48 = vpop.f32.mrf.mxu1  ;;  %v5101_v49 = vpop.f32.mrf.mxu0 }
 0x7b9   :  { %v4272_v50 = vadd.f32 %v4129_v47, %v3916_v2  ;;  %v4279_v55 = vadd.f32 %v4199_v57, %v3986_v53 }
 0x7ba   :  { %v4268_v51 = vpop.f32.mrf.mxu1 }
 0x7bb   :  { %v4425_v54 = vmul.f32 -1.442695, %v4272_v50  ;;  %v4426_v56 = vmul.f32 -1.442695, %v4279_v55  ;;  %v4269_v61 = vadd.f32 %v6175_v8, %v4268_v51 }
 0x7bc   :  { %v5106_v52 = vpop.f32.mrf.mxu1 }
 0x7bd   :  { %5183 = vpow2.f32 %v4425_v54 }
 0x7be   :  { %5185 = vpow2.f32 %v4426_v56 }
 0x7ca   :  { %v5184_v58 = vpop.eup %5183 }
 0x7cb   :  { %v4276_v21 = vadd.f32 1.0, %v5184_v58  ;;  %v5186_v59 = vpop.eup %5185 }
 0x7cc   :  { %v4283_v60 = vadd.f32 1.0, %v5186_v59 }
 0x7cd   :  { %5187 = vrcp.f32 %v4276_v21 }
 0x7ce   :  { %5189 = vrcp.f32 %v4283_v60 }
 0x7da   :  { %v5188_v62 = vpop.eup %5187 }
 0x7db   :  { %v4286_v9 = vmul.f32 %v5188_v62, %v4269_v61  ;;  %v5190_v24 = vpop.eup %5189 }
 0x7dc   :  { %v4289_v20 = vsub.f32 1.0, %v5190_v24  ;;  %v4291_v25 = vmul.f32 %v5190_v24, %v6185_v37 }
 0x7dd   :  { %v4287_v22 = vadd.f32 %v4286_v9, %v4056_v63 }
 0x7df   :  { %5191 = vtanh.f32 %v4287_v22 }
 0x7ec   :  { %v5192_v26 = vpop.eup %5191 }
 0x7ed   :  { %v4290_v28 = vmul.f32 %v5192_v26, %v4289_v20 }
 0x7ef   :  { %v4292_v27 = vadd.f32 %v4291_v25, %v4290_v28 }
 0x7f1   :  { %4294 = vst.msk [vmem:[#allocation4 + $0xe] sm:$0x3] %vm632_vm4, %v4292_v27 }
 0x7f2   :  { %5250 = shalt.err (!%p5247_p9)
}
 0x7f3   :  { %4318 = dma.vmem_to_hbm [thread:$0]  %s4313_s21, 256, %s6229_s9, [#allocation5], %s5266_s17, %s5266_s17, %s5267_s18  }
 0x7f4   :  { %5259 = dma.done.wait [#allocation3], 256  }
 0x7f5   :  { %5260 = vsyncadd [#allocation3], 4294967040 }
 0x7f6   :  { %5261 = dma.done.wait [#allocation5], 256  }
 0x7f7   :  { %5262 = vsyncadd [#allocation5], 4294967040 }
 0x7f8   :  { %4325 = vsyncpa [#allocation3], 1 }
 0x7f9   :  { %4326 = vsyncpa [#allocation5], 1 }

</bundles_post_ra>
